<compile_context>
chip_gen: v6e
topology: v6e:2x2x1
jax: 0.10.0
libtpu: 0.0.40
codegen_flags: <defaults>
</compile_context>

<pallas_src>
import numpy as np
import jax
import jax.numpy as jnp
from jax.experimental import pallas as pl
from jax.experimental.pallas import tpu as pltpu

C = 16
NUM_CLASSES = 10
IMG_SIZE = 16
N_CELLS = 2
N_CONV = 9                      # packed (C, C) channel matmuls (cells + post)

# per-block architecture sequence (complex_model_rebuild: fix_arc[i] per block)
# positions 4n / 4n+2 select the two inputs of cell n from the running `layers` list
FIX_ARC = [
    [0, 0, 1, 0, 2, 0, 1, 0],    # block 0: cell0 <- (layers[0], layers[1]); cell1 <- (layers[2], layers[1])
    [0, 0, 1, 0, 2, 0, 0, 0],    # block 1: cell0 <- (layers[0], layers[1]); cell1 <- (layers[2], layers[0])
]
HAS_CALIBRATE = (True, False)    # block 0 is the reduction block (calibrate != None) + post module
AUX_IND = 0                      # aux head taps block 0's output


# ------------------- per-sample forward math (channel-major) ----------------

def _forward_one(img1, img2, wstem, bstem, wcs, bcs, wfins, bfins, wfcs, bfcs,
                 rmats, s8to4t):
    """Full forward for ONE sample on channel-major (C, S) slabs.

    Pure jnp ops: traced both inside the Pallas kernel and (unchanged) as the
    pure-JAX reference."""
    f32 = jnp.float32

    def conv(x, w, b, relu_out=True):
        # 1x1 conv: (C_out, C_in) @ (C_in, S) + bias column
        y = jnp.dot(w, x, preferred_element_type=f32) + b
        return jnp.maximum(y, 0.0) if relu_out else y

    def resize(x, s_in, s_out):
        # bilinear (s_in,s_in)->(s_out,s_out) as a right-matmul with a
        # batch-free (s_in^2, s_out^2) constant
        if s_in == s_out:
            return x
        return jnp.dot(x, rmats[(s_in, s_out)], preferred_element_type=f32)

    def head(x, w_t, b_col):
        # fc head == global-avg-pool + linear; pooling commutes with the linear
        # map, so project first (MXU) and mean over the spatial lanes (XLU).
        y = jnp.dot(w_t, x, preferred_element_type=f32)          # (10, S)
        return jnp.mean(y, axis=-1, keepdims=True) + b_col       # (10, 1)

    h0 = IMG_SIZE
    layers_output = [(conv(img1, wstem[0], bstem[0]), h0),        # stride-1 stem
                     (conv(img2, wstem[1], bstem[1]), h0 // 2)]   # stride-2 stem

    wi = 0            # index into packed (C, C) conv stack
    fi = 0            # index into packed final_conv stack
    aux = None
    for blk, arc in enumerate(FIX_ARC):
        has_cal = HAS_CALIBRATE[blk]
        (x1a, x1s), (x2a, x2s) = layers_output
        s_in = x2s                                   # layer_maker.input_shape_x
        layers = [(resize(x1a, x1s, x2s), x2s), (x2a, x2s)]
        for nc in range(N_CELLS):
            xa, xs = layers[arc[4 * nc]]
            ya, ys = layers[arc[4 * nc + 2]]
            xo = conv(xa, wcs[wi], bcs[wi]); wi += 1             # x_oper
            yo = conv(ya, wcs[wi], bcs[wi]); wi += 1             # y_oper
            if xs != ys:                                         # node._rescale
                if xs > ys:
                    yo, ys = resize(yo, ys, xs), xs
                else:
                    xo, xs = resize(xo, xs, ys), ys
            # DropPath_ is identity; cat_add = elementwise add
            out, outs = xo + yo, xs
            if has_cal and outs != s_in // 2:                    # reduction block calibration
                out, outs = resize(out, outs, s_in // 2), s_in // 2
            # channel calibrate conv never fires (out channels == C == lm.inp)
            layers.append((out, outs))
        # final_conv: ReLU -> Conv1x1 over the channel concat of the two cell
        # outputs; in channel-major the concat is just a sublane stack, so this
        # is ONE K=2C matmul.
        (o0, o0s), (o1, _) = layers[2], layers[3]
        stacked = jnp.maximum(jnp.concatenate([o0, o1], axis=0), 0.0)     # (2C, S)
        fin = jnp.dot(wfins[fi], stacked, preferred_element_type=f32) + bfins[fi]
        fi += 1
        layers_output = [layers_output[-1], (fin, o0s)]
        if has_cal:
            # post module (bank[1]): stride-2 subsample (0/1 selection matmul) + conv1x1
            pa, ps = layers_output[0]
            pa = jnp.dot(pa, s8to4t, preferred_element_type=f32)
            layers_output[0] = (conv(pa, wcs[wi], bcs[wi], relu_out=False), ps // 2)
            wi += 1
        if blk == AUX_IND:
            aux = head(fin, wfcs[0], bfcs[0])                    # aux_fc

    assert wi == N_CONV
    out_final, _ = layers_output[1]
    logits = head(out_final, wfcs[1], bfcs[1])                   # fc
    return logits, aux                                           # each (10, 1)


def _unpack_consts(wstem, bstem, wc, bc, wfin, bfin, wfc, bfc, r_a, r_b, r_c, s8):
    """Works on Pallas refs (inside the kernel) and on plain arrays (reference)."""
    h0, h1, h2 = IMG_SIZE, IMG_SIZE // 2, IMG_SIZE // 4
    return ([wstem[k] for k in range(2)], [bstem[k] for k in range(2)],
            [wc[k] for k in range(N_CONV)], [bc[k] for k in range(N_CONV)],
            [wfin[k] for k in range(2)], [bfin[k] for k in range(2)],
            [wfc[k] for k in range(2)], [bfc[k] for k in range(2)],
            {(h0, h1): r_a[...], (h1, h2): r_b[...], (h2, h1): r_c[...]},
            s8[...])


# ------------------------------ Pallas kernel -------------------------------

def _fused_forward_kernel(img1_ref, img2_ref, wstem_ref, bstem_ref, wc_ref, bc_ref,
                          wfin_ref, bfin_ref, wfc_ref, bfc_ref,
                          r_a_ref, r_b_ref, r_c_ref, s8_ref,
                          logits_ref, aux_ref):
    consts = _unpack_consts(wstem_ref, bstem_ref, wc_ref, bc_ref, wfin_ref, bfin_ref,
                            wfc_ref, bfc_ref, r_a_ref, r_b_ref, r_c_ref, s8_ref)
    logits, aux = _forward_one(img1_ref[...], img2_ref[...], *consts)
    logits_ref[...] = logits      # (10, 1) per-sample block
    aux_ref[...] = aux


def _const_spec(shape):
    nd = len(shape)
    return pl.BlockSpec(shape, lambda b, _nd=nd: (0,) * _nd)


def model_forward(params, img_nchw):
    """Whole forward pass in one fused Pallas kernel; grid = batch (parallel)."""
    args = _build_kernel_args(params, img_nchw)
    n = img_nchw.shape[0]

    img_specs = [
        pl.BlockSpec((None,) + args[0].shape[1:], lambda b: (b, 0, 0)),   # (3, 256) per sample
        pl.BlockSpec((None,) + args[1].shape[1:], lambda b: (b, 0, 0)),   # (3, 64) per sample
    ]
    const_specs = [_const_spec(a.shape) for a in args[2:]]

    out_shape = (jax.ShapeDtypeStruct((n, NUM_CLASSES, 1), jnp.float32),  # fc logits
                 jax.ShapeDtypeStruct((n, NUM_CLASSES, 1), jnp.float32))  # aux logits
    out_specs = (pl.BlockSpec((None, NUM_CLASSES, 1), lambda b: (b, 0, 0)),
                 pl.BlockSpec((None, NUM_CLASSES, 1), lambda b: (b, 0, 0)))

    logits3, aux3 = pl.pallas_call(
        _fused_forward_kernel,
        out_shape=out_shape,
        grid=(n,),
        in_specs=img_specs + const_specs,
        out_specs=out_specs,
        compiler_params=pltpu.CompilerParams(
            dimension_semantics=("parallel",)),
    )(*args)
    return logits3[:, :, 0], aux3[:, :, 0]


def _reference_forward(params, img_nchw):
    # pure-JAX reference running exactly the same math on the same operands
    args = _build_kernel_args(params, img_nchw)
    img1, img2 = args[0], args[1]
    consts = _unpack_consts(*args[2:])
    logits, aux = [], []
    for b in range(img1.shape[0]):
        lo, au = _forward_one(img1[b], img2[b], *consts)
        logits.append(lo[:, 0])
        aux.append(au[:, 0])
    return jnp.stack(logits), jnp.stack(aux)


# ------------------------ constant matrices & packing -----------------------

def _interp_matrix(in_size, out_size):
    """PyTorch bilinear, align_corners=False, antialias=False, as (out, in)."""
    a = np.zeros((out_size, in_size), dtype=np.float32)
    scale = in_size / out_size
    for i in range(out_size):
        src = max((i + 0.5) * scale - 0.5, 0.0)
        i0 = min(int(np.floor(src)), in_size - 1)
        i1 = min(i0 + 1, in_size - 1)
        lam = src - i0
        a[i, i0] += 1.0 - lam
        a[i, i1] += lam
    return a


def _resize_matrix_t(s_in, s_out):
    """Batch-free bilinear map, transposed so it applies as x(C,S_in) @ Rt."""
    a = _interp_matrix(s_in, s_out)                 # (s_out, s_in)
    return jnp.asarray(np.kron(a, a).T)             # (s_in^2, s_out^2)


def _stride2_matrix_t(s_in):
    """Spatial stride-2 subsampling as a batch-free 0/1 selection, transposed."""
    s_out = s_in // 2
    m = np.zeros((s_in * s_in, s_out * s_out), dtype=np.float32)
    for i in range(s_out):
        for j in range(s_out):
            m[(2 * i) * s_in + 2 * j, i * s_out + j] = 1.0
    return jnp.asarray(m)


def _pack_params(params):
    """Stack weights pre-transposed for the channel-major W @ X layout."""
    b0, b1 = params['blocks']
    lm0, lm1 = b0['lm'], b1['lm']
    wf0, bf0 = lm0['final_conv']        # wf: (2C, C), bf: (C,)
    wf1, bf1 = lm1['final_conv']

    def t(w):                           # (C_in, C_out) -> (C_out, C_in)
        return jnp.transpose(w)

    def col(b):                         # (C_out,) -> (C_out, 1)
        return b[:, None]

    wstem = jnp.stack([t(params['start_conv1'][0]), t(params['start_conv2'][0])])      # (2, C, 3)
    bstem = jnp.stack([col(params['start_conv1'][1]), col(params['start_conv2'][1])])  # (2, C, 1)

    # order must match the wi walk in _forward_one
    wc = jnp.stack([
        t(lm0['cells'][0]['x'][0]), t(lm0['cells'][0]['y'][0]),   # block0 cell0 x/y
        t(lm0['cells'][1]['x'][0]), t(lm0['cells'][1]['y'][0]),   # block0 cell1 x/y
        t(b0['post'][0]),                                         # block0 post module
        t(lm1['cells'][0]['x'][0]), t(lm1['cells'][0]['y'][0]),   # block1 cell0 x/y
        t(lm1['cells'][1]['x'][0]), t(lm1['cells'][1]['y'][0]),   # block1 cell1 x/y
    ])                                                            # (9, C, C)
    bc = jnp.stack([
        col(lm0['cells'][0]['x'][1]), col(lm0['cells'][0]['y'][1]),
        col(lm0['cells'][1]['x'][1]), col(lm0['cells'][1]['y'][1]),
        col(b0['post'][1]),
        col(lm1['cells'][0]['x'][1]), col(lm1['cells'][0]['y'][1]),
        col(lm1['cells'][1]['x'][1]), col(lm1['cells'][1]['y'][1]),
    ])                                                            # (9, C, 1)

    wfin = jnp.stack([t(wf0), t(wf1)])                            # (2, C, 2C)
    bfin = jnp.stack([col(bf0), col(bf1)])                        # (2, C, 1)

    wfc = jnp.stack([t(params['aux_fc'][0]), t(params['fc'][0])])       # (2, 10, C)
    bfc = jnp.stack([col(params['aux_fc'][1]), col(params['fc'][1])])   # (2, 10, 1)
    return wstem, bstem, wc, bc, wfin, bfin, wfc, bfc


def _build_kernel_args(params, img_nchw):
    n, cin, h, w = img_nchw.shape
    assert (h, w) == (IMG_SIZE, IMG_SIZE) and cin == 3
    # channel-major per-sample slabs (no NHWC transpose needed)
    img1 = img_nchw.reshape(n, cin, h * w).astype(jnp.float32)                      # (N, 3, 256)
    img2 = img_nchw[:, :, ::2, ::2].reshape(n, cin, (h // 2) * (w // 2)).astype(jnp.float32)  # (N, 3, 64)

    wstem, bstem, wc, bc, wfin, bfin, wfc, bfc = _pack_params(params)
    h0, h1, h2 = IMG_SIZE, IMG_SIZE // 2, IMG_SIZE // 4
    r_16_8 = _resize_matrix_t(h0, h1)          # (256, 64)
    r_8_4 = _resize_matrix_t(h1, h2)           # (64, 16)
    r_4_8 = _resize_matrix_t(h2, h1)           # (16, 64)
    s8to4 = _stride2_matrix_t(h1)              # (64, 16)
    return (img1, img2, wstem, bstem, wc, bc, wfin, bfin, wfc, bfc,
            r_16_8, r_8_4, r_4_8, s8to4)


# ------------------------------- parameters ---------------------------------

def init_params(key):
    keys = list(jax.random.split(key, 64))

    def conv_p(cin, cout):
        w = jax.random.normal(keys.pop(), (cin, cout), jnp.float32) * 0.1
        b = jax.random.normal(keys.pop(), (cout,), jnp.float32) * 0.1
        return (w, b)

    def cell_p():
        return {'x': conv_p(C, C), 'y': conv_p(C, C)}

    def lm_p(has_calibrate):
        return {
            'cells': [cell_p() for _ in range(N_CELLS)],
            'final_conv': conv_p(N_CELLS * C, C),              # final_conv[3]: Conv2d(2C->C, 1x1)
            # calibrate exists on the reduction block but never fires (channels already match)
            'calibrate': conv_p(C, C) if has_calibrate else None,
            'inp': (N_CELLS * C) // N_CELLS,
        }

    return {
        'start_conv1': conv_p(3, C),
        'start_conv2': conv_p(3, C),
        'blocks': [
            {'lm': lm_p(True), 'post': conv_p(C, C)},          # reduction block + bank[1]
            {'lm': lm_p(False)},                               # normal block
        ],
        'fc': conv_p(C, NUM_CLASSES),
        'aux_fc': conv_p(C, NUM_CLASSES),
        'aux_ind': AUX_IND,
    }


if __name__ == "__main__":
    key = jax.random.PRNGKey(0)
    pkey, ikey = jax.random.split(key)
    params = init_params(pkey)
    img = jax.random.normal(ikey, (2, 3, IMG_SIZE, IMG_SIZE), jnp.float32)   # NCHW, like PyTorch

    fwd = jax.jit(model_forward)
    logits, aux = fwd(params, img)
    jax.block_until_ready((logits, aux))

    assert logits.shape == (2, NUM_CLASSES)
    assert aux.shape == (2, NUM_CLASSES)
    assert bool(jnp.all(jnp.isfinite(logits))) and bool(jnp.all(jnp.isfinite(aux)))

    # correctness guard: identical math traced as plain XLA (backend rounding only)
    ref_logits, ref_aux = _reference_forward(params, img)
    assert bool(jnp.allclose(logits, ref_logits, atol=2e-3, rtol=2e-3))
    assert bool(jnp.allclose(aux, ref_aux, atol=2e-3, rtol=2e-3))

    print("KERNEL_OK")
</pallas_src>

<mosaic_0001>
module attributes {stable_mosaic.version = 11 : i64} {
  func.func @_fused_forward_kernel(%arg0: i32, %arg1: memref<1x3x256xf32, #tpu.memory_space<vmem>>, %arg2: memref<1x3x64xf32, #tpu.memory_space<vmem>>, %arg3: memref<2x16x3xf32, #tpu.memory_space<vmem>>, %arg4: memref<2x16x1xf32, #tpu.memory_space<vmem>>, %arg5: memref<9x16x16xf32, #tpu.memory_space<vmem>>, %arg6: memref<9x16x1xf32, #tpu.memory_space<vmem>>, %arg7: memref<2x16x32xf32, #tpu.memory_space<vmem>>, %arg8: memref<2x16x1xf32, #tpu.memory_space<vmem>>, %arg9: memref<2x10x16xf32, #tpu.memory_space<vmem>>, %arg10: memref<2x10x1xf32, #tpu.memory_space<vmem>>, %arg11: memref<256x64xf32, #tpu.memory_space<vmem>>, %arg12: memref<64x16xf32, #tpu.memory_space<vmem>>, %arg13: memref<16x64xf32, #tpu.memory_space<vmem>>, %arg14: memref<64x16xf32, #tpu.memory_space<vmem>>, %arg15: memref<1x10x1xf32, #tpu.memory_space<vmem>>, %arg16: memref<1x10x1xf32, #tpu.memory_space<vmem>>) attributes {dimension_semantics = [#tpu.dimension_semantics<parallel>], iteration_bounds = array<i64: 2>, scalar_prefetch = 0 : i64, scratch_operands = 0 : i64, tpu.core_type = #tpu.core_type<tc>, window_params = [{transform_indices = @transform_0, window_bounds = array<i64: 1, 3, 256>}, {transform_indices = @transform_1, window_bounds = array<i64: 1, 3, 64>}, {pipeline_mode = #tpu.pipeline_mode<synchronous>, transform_indices = @transform_2, window_bounds = array<i64: 2, 16, 3>}, {pipeline_mode = #tpu.pipeline_mode<synchronous>, transform_indices = @transform_3, window_bounds = array<i64: 2, 16, 1>}, {pipeline_mode = #tpu.pipeline_mode<synchronous>, transform_indices = @transform_4, window_bounds = array<i64: 9, 16, 16>}, {pipeline_mode = #tpu.pipeline_mode<synchronous>, transform_indices = @transform_5, window_bounds = array<i64: 9, 16, 1>}, {pipeline_mode = #tpu.pipeline_mode<synchronous>, transform_indices = @transform_6, window_bounds = array<i64: 2, 16, 32>}, {pipeline_mode = #tpu.pipeline_mode<synchronous>, transform_indices = @transform_7, window_bounds = array<i64: 2, 16, 1>}, {pipeline_mode = #tpu.pipeline_mode<synchronous>, transform_indices = @transform_8, window_bounds = array<i64: 2, 10, 16>}, {pipeline_mode = #tpu.pipeline_mode<synchronous>, transform_indices = @transform_9, window_bounds = array<i64: 2, 10, 1>}, {pipeline_mode = #tpu.pipeline_mode<synchronous>, transform_indices = @transform_10, window_bounds = array<i64: 256, 64>}, {pipeline_mode = #tpu.pipeline_mode<synchronous>, transform_indices = @transform_11, window_bounds = array<i64: 64, 16>}, {pipeline_mode = #tpu.pipeline_mode<synchronous>, transform_indices = @transform_12, window_bounds = array<i64: 16, 64>}, {pipeline_mode = #tpu.pipeline_mode<synchronous>, transform_indices = @transform_13, window_bounds = array<i64: 64, 16>}, {transform_indices = @transform_14, window_bounds = array<i64: 1, 10, 1>}, {transform_indices = @transform_15, window_bounds = array<i64: 1, 10, 1>}]} {
    %c0 = arith.constant 0 : index
    %c0_0 = arith.constant 0 : index
    %c0_1 = arith.constant 0 : index
    %0 = vector.load %arg3[%c0, %c0_0, %c0_1] : memref<2x16x3xf32, #tpu.memory_space<vmem>>, vector<1x16x3xf32>
    %1 = vector.shape_cast %0 : vector<1x16x3xf32> to vector<16x3xf32>
    %c1 = arith.constant 1 : index
    %c0_2 = arith.constant 0 : index
    %c0_3 = arith.constant 0 : index
    %2 = vector.load %arg3[%c1, %c0_2, %c0_3] : memref<2x16x3xf32, #tpu.memory_space<vmem>>, vector<1x16x3xf32>
    %3 = vector.shape_cast %2 : vector<1x16x3xf32> to vector<16x3xf32>
    %c0_4 = arith.constant 0 : index
    %c0_5 = arith.constant 0 : index
    %c0_6 = arith.constant 0 : index
    %4 = vector.load %arg4[%c0_4, %c0_5, %c0_6] : memref<2x16x1xf32, #tpu.memory_space<vmem>>, vector<1x16x1xf32>
    %5 = vector.shape_cast %4 : vector<1x16x1xf32> to vector<16x1xf32>
    %c1_7 = arith.constant 1 : index
    %c0_8 = arith.constant 0 : index
    %c0_9 = arith.constant 0 : index
    %6 = vector.load %arg4[%c1_7, %c0_8, %c0_9] : memref<2x16x1xf32, #tpu.memory_space<vmem>>, vector<1x16x1xf32>
    %7 = vector.shape_cast %6 : vector<1x16x1xf32> to vector<16x1xf32>
    %c0_10 = arith.constant 0 : index
    %c0_11 = arith.constant 0 : index
    %c0_12 = arith.constant 0 : index
    %8 = vector.load %arg5[%c0_10, %c0_11, %c0_12] : memref<9x16x16xf32, #tpu.memory_space<vmem>>, vector<1x16x16xf32>
    %9 = vector.shape_cast %8 : vector<1x16x16xf32> to vector<16x16xf32>
    %c1_13 = arith.constant 1 : index
    %c0_14 = arith.constant 0 : index
    %c0_15 = arith.constant 0 : index
    %10 = vector.load %arg5[%c1_13, %c0_14, %c0_15] : memref<9x16x16xf32, #tpu.memory_space<vmem>>, vector<1x16x16xf32>
    %11 = vector.shape_cast %10 : vector<1x16x16xf32> to vector<16x16xf32>
    %c2 = arith.constant 2 : index
    %c0_16 = arith.constant 0 : index
    %c0_17 = arith.constant 0 : index
    %12 = vector.load %arg5[%c2, %c0_16, %c0_17] : memref<9x16x16xf32, #tpu.memory_space<vmem>>, vector<1x16x16xf32>
    %13 = vector.shape_cast %12 : vector<1x16x16xf32> to vector<16x16xf32>
    %c3 = arith.constant 3 : index
    %c0_18 = arith.constant 0 : index
    %c0_19 = arith.constant 0 : index
    %14 = vector.load %arg5[%c3, %c0_18, %c0_19] : memref<9x16x16xf32, #tpu.memory_space<vmem>>, vector<1x16x16xf32>
    %15 = vector.shape_cast %14 : vector<1x16x16xf32> to vector<16x16xf32>
    %c4 = arith.constant 4 : index
    %c0_20 = arith.constant 0 : index
    %c0_21 = arith.constant 0 : index
    %16 = vector.load %arg5[%c4, %c0_20, %c0_21] : memref<9x16x16xf32, #tpu.memory_space<vmem>>, vector<1x16x16xf32>
    %17 = vector.shape_cast %16 : vector<1x16x16xf32> to vector<16x16xf32>
    %c5 = arith.constant 5 : index
    %c0_22 = arith.constant 0 : index
    %c0_23 = arith.constant 0 : index
    %18 = vector.load %arg5[%c5, %c0_22, %c0_23] : memref<9x16x16xf32, #tpu.memory_space<vmem>>, vector<1x16x16xf32>
    %19 = vector.shape_cast %18 : vector<1x16x16xf32> to vector<16x16xf32>
    %c6 = arith.constant 6 : index
    %c0_24 = arith.constant 0 : index
    %c0_25 = arith.constant 0 : index
    %20 = vector.load %arg5[%c6, %c0_24, %c0_25] : memref<9x16x16xf32, #tpu.memory_space<vmem>>, vector<1x16x16xf32>
    %21 = vector.shape_cast %20 : vector<1x16x16xf32> to vector<16x16xf32>
    %c7 = arith.constant 7 : index
    %c0_26 = arith.constant 0 : index
    %c0_27 = arith.constant 0 : index
    %22 = vector.load %arg5[%c7, %c0_26, %c0_27] : memref<9x16x16xf32, #tpu.memory_space<vmem>>, vector<1x16x16xf32>
    %23 = vector.shape_cast %22 : vector<1x16x16xf32> to vector<16x16xf32>
    %c8 = arith.constant 8 : index
    %c0_28 = arith.constant 0 : index
    %c0_29 = arith.constant 0 : index
    %24 = vector.load %arg5[%c8, %c0_28, %c0_29] : memref<9x16x16xf32, #tpu.memory_space<vmem>>, vector<1x16x16xf32>
    %25 = vector.shape_cast %24 : vector<1x16x16xf32> to vector<16x16xf32>
    %c0_30 = arith.constant 0 : index
    %c0_31 = arith.constant 0 : index
    %c0_32 = arith.constant 0 : index
    %26 = vector.load %arg6[%c0_30, %c0_31, %c0_32] : memref<9x16x1xf32, #tpu.memory_space<vmem>>, vector<1x16x1xf32>
    %27 = vector.shape_cast %26 : vector<1x16x1xf32> to vector<16x1xf32>
    %c1_33 = arith.constant 1 : index
    %c0_34 = arith.constant 0 : index
    %c0_35 = arith.constant 0 : index
    %28 = vector.load %arg6[%c1_33, %c0_34, %c0_35] : memref<9x16x1xf32, #tpu.memory_space<vmem>>, vector<1x16x1xf32>
    %29 = vector.shape_cast %28 : vector<1x16x1xf32> to vector<16x1xf32>
    %c2_36 = arith.constant 2 : index
    %c0_37 = arith.constant 0 : index
    %c0_38 = arith.constant 0 : index
    %30 = vector.load %arg6[%c2_36, %c0_37, %c0_38] : memref<9x16x1xf32, #tpu.memory_space<vmem>>, vector<1x16x1xf32>
    %31 = vector.shape_cast %30 : vector<1x16x1xf32> to vector<16x1xf32>
    %c3_39 = arith.constant 3 : index
    %c0_40 = arith.constant 0 : index
    %c0_41 = arith.constant 0 : index
    %32 = vector.load %arg6[%c3_39, %c0_40, %c0_41] : memref<9x16x1xf32, #tpu.memory_space<vmem>>, vector<1x16x1xf32>
    %33 = vector.shape_cast %32 : vector<1x16x1xf32> to vector<16x1xf32>
    %c4_42 = arith.constant 4 : index
    %c0_43 = arith.constant 0 : index
    %c0_44 = arith.constant 0 : index
    %34 = vector.load %arg6[%c4_42, %c0_43, %c0_44] : memref<9x16x1xf32, #tpu.memory_space<vmem>>, vector<1x16x1xf32>
    %35 = vector.shape_cast %34 : vector<1x16x1xf32> to vector<16x1xf32>
    %c5_45 = arith.constant 5 : index
    %c0_46 = arith.constant 0 : index
    %c0_47 = arith.constant 0 : index
    %36 = vector.load %arg6[%c5_45, %c0_46, %c0_47] : memref<9x16x1xf32, #tpu.memory_space<vmem>>, vector<1x16x1xf32>
    %37 = vector.shape_cast %36 : vector<1x16x1xf32> to vector<16x1xf32>
    %c6_48 = arith.constant 6 : index
    %c0_49 = arith.constant 0 : index
    %c0_50 = arith.constant 0 : index
    %38 = vector.load %arg6[%c6_48, %c0_49, %c0_50] : memref<9x16x1xf32, #tpu.memory_space<vmem>>, vector<1x16x1xf32>
    %39 = vector.shape_cast %38 : vector<1x16x1xf32> to vector<16x1xf32>
    %c7_51 = arith.constant 7 : index
    %c0_52 = arith.constant 0 : index
    %c0_53 = arith.constant 0 : index
    %40 = vector.load %arg6[%c7_51, %c0_52, %c0_53] : memref<9x16x1xf32, #tpu.memory_space<vmem>>, vector<1x16x1xf32>
    %41 = vector.shape_cast %40 : vector<1x16x1xf32> to vector<16x1xf32>
    %c8_54 = arith.constant 8 : index
    %c0_55 = arith.constant 0 : index
    %c0_56 = arith.constant 0 : index
    %42 = vector.load %arg6[%c8_54, %c0_55, %c0_56] : memref<9x16x1xf32, #tpu.memory_space<vmem>>, vector<1x16x1xf32>
    %43 = vector.shape_cast %42 : vector<1x16x1xf32> to vector<16x1xf32>
    %c0_57 = arith.constant 0 : index
    %c0_58 = arith.constant 0 : index
    %c0_59 = arith.constant 0 : index
    %44 = vector.load %arg7[%c0_57, %c0_58, %c0_59] : memref<2x16x32xf32, #tpu.memory_space<vmem>>, vector<1x16x32xf32>
    %45 = vector.shape_cast %44 : vector<1x16x32xf32> to vector<16x32xf32>
    %c1_60 = arith.constant 1 : index
    %c0_61 = arith.constant 0 : index
    %c0_62 = arith.constant 0 : index
    %46 = vector.load %arg7[%c1_60, %c0_61, %c0_62] : memref<2x16x32xf32, #tpu.memory_space<vmem>>, vector<1x16x32xf32>
    %47 = vector.shape_cast %46 : vector<1x16x32xf32> to vector<16x32xf32>
    %c0_63 = arith.constant 0 : index
    %c0_64 = arith.constant 0 : index
    %c0_65 = arith.constant 0 : index
    %48 = vector.load %arg8[%c0_63, %c0_64, %c0_65] : memref<2x16x1xf32, #tpu.memory_space<vmem>>, vector<1x16x1xf32>
    %49 = vector.shape_cast %48 : vector<1x16x1xf32> to vector<16x1xf32>
    %c1_66 = arith.constant 1 : index
    %c0_67 = arith.constant 0 : index
    %c0_68 = arith.constant 0 : index
    %50 = vector.load %arg8[%c1_66, %c0_67, %c0_68] : memref<2x16x1xf32, #tpu.memory_space<vmem>>, vector<1x16x1xf32>
    %51 = vector.shape_cast %50 : vector<1x16x1xf32> to vector<16x1xf32>
    %c0_69 = arith.constant 0 : index
    %c0_70 = arith.constant 0 : index
    %c0_71 = arith.constant 0 : index
    %52 = vector.load %arg9[%c0_69, %c0_70, %c0_71] : memref<2x10x16xf32, #tpu.memory_space<vmem>>, vector<1x10x16xf32>
    %53 = vector.shape_cast %52 : vector<1x10x16xf32> to vector<10x16xf32>
    %c1_72 = arith.constant 1 : index
    %c0_73 = arith.constant 0 : index
    %c0_74 = arith.constant 0 : index
    %54 = vector.load %arg9[%c1_72, %c0_73, %c0_74] : memref<2x10x16xf32, #tpu.memory_space<vmem>>, vector<1x10x16xf32>
    %55 = vector.shape_cast %54 : vector<1x10x16xf32> to vector<10x16xf32>
    %c0_75 = arith.constant 0 : index
    %c0_76 = arith.constant 0 : index
    %c0_77 = arith.constant 0 : index
    %56 = vector.load %arg10[%c0_75, %c0_76, %c0_77] : memref<2x10x1xf32, #tpu.memory_space<vmem>>, vector<1x10x1xf32>
    %57 = vector.shape_cast %56 : vector<1x10x1xf32> to vector<10x1xf32>
    %c1_78 = arith.constant 1 : index
    %c0_79 = arith.constant 0 : index
    %c0_80 = arith.constant 0 : index
    %58 = vector.load %arg10[%c1_78, %c0_79, %c0_80] : memref<2x10x1xf32, #tpu.memory_space<vmem>>, vector<1x10x1xf32>
    %59 = vector.shape_cast %58 : vector<1x10x1xf32> to vector<10x1xf32>
    %c0_81 = arith.constant 0 : index
    %c0_82 = arith.constant 0 : index
    %60 = vector.load %arg11[%c0_81, %c0_82] : memref<256x64xf32, #tpu.memory_space<vmem>>, vector<256x64xf32>
    %c0_83 = arith.constant 0 : index
    %c0_84 = arith.constant 0 : index
    %61 = vector.load %arg12[%c0_83, %c0_84] : memref<64x16xf32, #tpu.memory_space<vmem>>, vector<64x16xf32>
    %c0_85 = arith.constant 0 : index
    %c0_86 = arith.constant 0 : index
    %62 = vector.load %arg13[%c0_85, %c0_86] : memref<16x64xf32, #tpu.memory_space<vmem>>, vector<16x64xf32>
    %c0_87 = arith.constant 0 : index
    %c0_88 = arith.constant 0 : index
    %63 = vector.load %arg14[%c0_87, %c0_88] : memref<64x16xf32, #tpu.memory_space<vmem>>, vector<64x16xf32>
    %c0_89 = arith.constant 0 : index
    %c0_90 = arith.constant 0 : index
    %c0_91 = arith.constant 0 : index
    %64 = vector.load %arg1[%c0_89, %c0_90, %c0_91] : memref<1x3x256xf32, #tpu.memory_space<vmem>>, vector<1x3x256xf32>
    %65 = vector.shape_cast %64 : vector<1x3x256xf32> to vector<3x256xf32>
    %c0_92 = arith.constant 0 : index
    %c0_93 = arith.constant 0 : index
    %c0_94 = arith.constant 0 : index
    %66 = vector.load %arg2[%c0_92, %c0_93, %c0_94] : memref<1x3x64xf32, #tpu.memory_space<vmem>>, vector<1x3x64xf32>
    %67 = vector.shape_cast %66 : vector<1x3x64xf32> to vector<3x64xf32>
    %cst = arith.constant dense<0.000000e+00> : vector<16x256xf32>
    %68 = tpu.matmul %1, %65, %cst {dimension_numbers = #tpu.dot_dimension_numbers<[1], [0], [0], [1], [0, 0, 1, 1], [], []>} : vector<16x3xf32>, vector<3x256xf32>, vector<16x256xf32> -> vector<16x256xf32>
    %69 = vector.broadcast %5 : vector<16x1xf32> to vector<16x256xf32>
    %70 = arith.addf %68, %69 : vector<16x256xf32>
    %cst_95 = arith.constant 0.000000e+00 : f32
    %71 = vector.broadcast %cst_95 : f32 to vector<16x256xf32>
    %72 = arith.maximumf %70, %71 : vector<16x256xf32>
    %cst_96 = arith.constant dense<0.000000e+00> : vector<16x64xf32>
    %73 = tpu.matmul %3, %67, %cst_96 {dimension_numbers = #tpu.dot_dimension_numbers<[1], [0], [0], [1], [0, 0, 1, 1], [], []>} : vector<16x3xf32>, vector<3x64xf32>, vector<16x64xf32> -> vector<16x64xf32>
    %74 = vector.broadcast %7 : vector<16x1xf32> to vector<16x64xf32>
    %75 = arith.addf %73, %74 : vector<16x64xf32>
    %cst_97 = arith.constant 0.000000e+00 : f32
    %76 = vector.broadcast %cst_97 : f32 to vector<16x64xf32>
    %77 = arith.maximumf %75, %76 : vector<16x64xf32>
    %cst_98 = arith.constant dense<0.000000e+00> : vector<16x64xf32>
    %78 = tpu.matmul %72, %60, %cst_98 {dimension_numbers = #tpu.dot_dimension_numbers<[1], [0], [0], [1], [0, 0, 1, 1], [], []>} : vector<16x256xf32>, vector<256x64xf32>, vector<16x64xf32> -> vector<16x64xf32>
    %cst_99 = arith.constant dense<0.000000e+00> : vector<16x64xf32>
    %79 = tpu.matmul %9, %78, %cst_99 {dimension_numbers = #tpu.dot_dimension_numbers<[1], [0], [0], [1], [0, 0, 1, 1], [], []>} : vector<16x16xf32>, vector<16x64xf32>, vector<16x64xf32> -> vector<16x64xf32>
    %80 = vector.broadcast %27 : vector<16x1xf32> to vector<16x64xf32>
    %81 = arith.addf %79, %80 : vector<16x64xf32>
    %cst_100 = arith.constant 0.000000e+00 : f32
    %82 = vector.broadcast %cst_100 : f32 to vector<16x64xf32>
    %83 = arith.maximumf %81, %82 : vector<16x64xf32>
    %cst_101 = arith.constant dense<0.000000e+00> : vector<16x64xf32>
    %84 = tpu.matmul %11, %77, %cst_101 {dimension_numbers = #tpu.dot_dimension_numbers<[1], [0], [0], [1], [0, 0, 1, 1], [], []>} : vector<16x16xf32>, vector<16x64xf32>, vector<16x64xf32> -> vector<16x64xf32>
    %85 = vector.broadcast %29 : vector<16x1xf32> to vector<16x64xf32>
    %86 = arith.addf %84, %85 : vector<16x64xf32>
    %cst_102 = arith.constant 0.000000e+00 : f32
    %87 = vector.broadcast %cst_102 : f32 to vector<16x64xf32>
    %88 = arith.maximumf %86, %87 : vector<16x64xf32>
    %89 = arith.addf %83, %88 : vector<16x64xf32>
    %cst_103 = arith.constant dense<0.000000e+00> : vector<16x16xf32>
    %90 = tpu.matmul %89, %61, %cst_103 {dimension_numbers = #tpu.dot_dimension_numbers<[1], [0], [0], [1], [0, 0, 1, 1], [], []>} : vector<16x64xf32>, vector<64x16xf32>, vector<16x16xf32> -> vector<16x16xf32>
    %cst_104 = arith.constant dense<0.000000e+00> : vector<16x16xf32>
    %91 = tpu.matmul %13, %90, %cst_104 {dimension_numbers = #tpu.dot_dimension_numbers<[1], [0], [0], [1], [0, 0, 1, 1], [], []>} : vector<16x16xf32>, vector<16x16xf32>, vector<16x16xf32> -> vector<16x16xf32>
    %92 = vector.broadcast %31 : vector<16x1xf32> to vector<16x16xf32>
    %93 = arith.addf %91, %92 : vector<16x16xf32>
    %cst_105 = arith.constant 0.000000e+00 : f32
    %94 = vector.broadcast %cst_105 : f32 to vector<16x16xf32>
    %95 = arith.maximumf %93, %94 : vector<16x16xf32>
    %cst_106 = arith.constant dense<0.000000e+00> : vector<16x64xf32>
    %96 = tpu.matmul %15, %77, %cst_106 {dimension_numbers = #tpu.dot_dimension_numbers<[1], [0], [0], [1], [0, 0, 1, 1], [], []>} : vector<16x16xf32>, vector<16x64xf32>, vector<16x64xf32> -> vector<16x64xf32>
    %97 = vector.broadcast %33 : vector<16x1xf32> to vector<16x64xf32>
    %98 = arith.addf %96, %97 : vector<16x64xf32>
    %cst_107 = arith.constant 0.000000e+00 : f32
    %99 = vector.broadcast %cst_107 : f32 to vector<16x64xf32>
    %100 = arith.maximumf %98, %99 : vector<16x64xf32>
    %cst_108 = arith.constant dense<0.000000e+00> : vector<16x64xf32>
    %101 = tpu.matmul %95, %62, %cst_108 {dimension_numbers = #tpu.dot_dimension_numbers<[1], [0], [0], [1], [0, 0, 1, 1], [], []>} : vector<16x16xf32>, vector<16x64xf32>, vector<16x64xf32> -> vector<16x64xf32>
    %102 = arith.addf %101, %100 : vector<16x64xf32>
    %cst_109 = arith.constant dense<0.000000e+00> : vector<16x16xf32>
    %103 = tpu.matmul %102, %61, %cst_109 {dimension_numbers = #tpu.dot_dimension_numbers<[1], [0], [0], [1], [0, 0, 1, 1], [], []>} : vector<16x64xf32>, vector<64x16xf32>, vector<16x16xf32> -> vector<16x16xf32>
    %104 = tpu.concatenate %90, %103 in 0 : vector<16x16xf32>, vector<16x16xf32> -> vector<32x16xf32>
    %cst_110 = arith.constant 0.000000e+00 : f32
    %105 = vector.broadcast %cst_110 : f32 to vector<32x16xf32>
    %106 = arith.maximumf %104, %105 : vector<32x16xf32>
    %cst_111 = arith.constant dense<0.000000e+00> : vector<16x16xf32>
    %107 = tpu.matmul %45, %106, %cst_111 {dimension_numbers = #tpu.dot_dimension_numbers<[1], [0], [0], [1], [0, 0, 1, 1], [], []>} : vector<16x32xf32>, vector<32x16xf32>, vector<16x16xf32> -> vector<16x16xf32>
    %108 = vector.broadcast %49 : vector<16x1xf32> to vector<16x16xf32>
    %109 = arith.addf %107, %108 : vector<16x16xf32>
    %cst_112 = arith.constant dense<0.000000e+00> : vector<16x16xf32>
    %110 = tpu.matmul %77, %63, %cst_112 {dimension_numbers = #tpu.dot_dimension_numbers<[1], [0], [0], [1], [0, 0, 1, 1], [], []>} : vector<16x64xf32>, vector<64x16xf32>, vector<16x16xf32> -> vector<16x16xf32>
    %cst_113 = arith.constant dense<0.000000e+00> : vector<16x16xf32>
    %111 = tpu.matmul %17, %110, %cst_113 {dimension_numbers = #tpu.dot_dimension_numbers<[1], [0], [0], [1], [0, 0, 1, 1], [], []>} : vector<16x16xf32>, vector<16x16xf32>, vector<16x16xf32> -> vector<16x16xf32>
    %112 = vector.broadcast %35 : vector<16x1xf32> to vector<16x16xf32>
    %113 = arith.addf %111, %112 : vector<16x16xf32>
    %cst_114 = arith.constant dense<0.000000e+00> : vector<10x16xf32>
    %114 = tpu.matmul %53, %109, %cst_114 {dimension_numbers = #tpu.dot_dimension_numbers<[1], [0], [0], [1], [0, 0, 1, 1], [], []>} : vector<10x16xf32>, vector<16x16xf32>, vector<10x16xf32> -> vector<10x16xf32>
    %cst_115 = arith.constant dense<0.000000e+00> : vector<10xf32>
    %115 = vector.multi_reduction <add>, %114, %cst_115 [1] : vector<10x16xf32> to vector<10xf32>
    %116 = vector.shape_cast %115 : vector<10xf32> to vector<10x1xf32>
    %cst_116 = arith.constant 1.600000e+01 : f32
    %117 = vector.broadcast %cst_116 : f32 to vector<10x1xf32>
    %118 = arith.divf %116, %117 : vector<10x1xf32>
    %119 = arith.addf %118, %57 : vector<10x1xf32>
    %cst_117 = arith.constant dense<0.000000e+00> : vector<16x16xf32>
    %120 = tpu.matmul %19, %113, %cst_117 {dimension_numbers = #tpu.dot_dimension_numbers<[1], [0], [0], [1], [0, 0, 1, 1], [], []>} : vector<16x16xf32>, vector<16x16xf32>, vector<16x16xf32> -> vector<16x16xf32>
    %121 = vector.broadcast %37 : vector<16x1xf32> to vector<16x16xf32>
    %122 = arith.addf %120, %121 : vector<16x16xf32>
    %cst_118 = arith.constant 0.000000e+00 : f32
    %123 = vector.broadcast %cst_118 : f32 to vector<16x16xf32>
    %124 = arith.maximumf %122, %123 : vector<16x16xf32>
    %cst_119 = arith.constant dense<0.000000e+00> : vector<16x16xf32>
    %125 = tpu.matmul %21, %109, %cst_119 {dimension_numbers = #tpu.dot_dimension_numbers<[1], [0], [0], [1], [0, 0, 1, 1], [], []>} : vector<16x16xf32>, vector<16x16xf32>, vector<16x16xf32> -> vector<16x16xf32>
    %126 = vector.broadcast %39 : vector<16x1xf32> to vector<16x16xf32>
    %127 = arith.addf %125, %126 : vector<16x16xf32>
    %cst_120 = arith.constant 0.000000e+00 : f32
    %128 = vector.broadcast %cst_120 : f32 to vector<16x16xf32>
    %129 = arith.maximumf %127, %128 : vector<16x16xf32>
    %130 = arith.addf %124, %129 : vector<16x16xf32>
    %cst_121 = arith.constant dense<0.000000e+00> : vector<16x16xf32>
    %131 = tpu.matmul %23, %130, %cst_121 {dimension_numbers = #tpu.dot_dimension_numbers<[1], [0], [0], [1], [0, 0, 1, 1], [], []>} : vector<16x16xf32>, vector<16x16xf32>, vector<16x16xf32> -> vector<16x16xf32>
    %132 = vector.broadcast %41 : vector<16x1xf32> to vector<16x16xf32>
    %133 = arith.addf %131, %132 : vector<16x16xf32>
    %cst_122 = arith.constant 0.000000e+00 : f32
    %134 = vector.broadcast %cst_122 : f32 to vector<16x16xf32>
    %135 = arith.maximumf %133, %134 : vector<16x16xf32>
    %cst_123 = arith.constant dense<0.000000e+00> : vector<16x16xf32>
    %136 = tpu.matmul %25, %113, %cst_123 {dimension_numbers = #tpu.dot_dimension_numbers<[1], [0], [0], [1], [0, 0, 1, 1], [], []>} : vector<16x16xf32>, vector<16x16xf32>, vector<16x16xf32> -> vector<16x16xf32>
    %137 = vector.broadcast %43 : vector<16x1xf32> to vector<16x16xf32>
    %138 = arith.addf %136, %137 : vector<16x16xf32>
    %cst_124 = arith.constant 0.000000e+00 : f32
    %139 = vector.broadcast %cst_124 : f32 to vector<16x16xf32>
    %140 = arith.maximumf %138, %139 : vector<16x16xf32>
    %141 = arith.addf %135, %140 : vector<16x16xf32>
    %142 = tpu.concatenate %130, %141 in 0 : vector<16x16xf32>, vector<16x16xf32> -> vector<32x16xf32>
    %cst_125 = arith.constant 0.000000e+00 : f32
    %143 = vector.broadcast %cst_125 : f32 to vector<32x16xf32>
    %144 = arith.maximumf %142, %143 : vector<32x16xf32>
    %cst_126 = arith.constant dense<0.000000e+00> : vector<16x16xf32>
    %145 = tpu.matmul %47, %144, %cst_126 {dimension_numbers = #tpu.dot_dimension_numbers<[1], [0], [0], [1], [0, 0, 1, 1], [], []>} : vector<16x32xf32>, vector<32x16xf32>, vector<16x16xf32> -> vector<16x16xf32>
    %146 = vector.broadcast %51 : vector<16x1xf32> to vector<16x16xf32>
    %147 = arith.addf %145, %146 : vector<16x16xf32>
    %cst_127 = arith.constant dense<0.000000e+00> : vector<10x16xf32>
    %148 = tpu.matmul %55, %147, %cst_127 {dimension_numbers = #tpu.dot_dimension_numbers<[1], [0], [0], [1], [0, 0, 1, 1], [], []>} : vector<10x16xf32>, vector<16x16xf32>, vector<10x16xf32> -> vector<10x16xf32>
    %cst_128 = arith.constant dense<0.000000e+00> : vector<10xf32>
    %149 = vector.multi_reduction <add>, %148, %cst_128 [1] : vector<10x16xf32> to vector<10xf32>
    %150 = vector.shape_cast %149 : vector<10xf32> to vector<10x1xf32>
    %cst_129 = arith.constant 1.600000e+01 : f32
    %151 = vector.broadcast %cst_129 : f32 to vector<10x1xf32>
    %152 = arith.divf %150, %151 : vector<10x1xf32>
    %153 = arith.addf %152, %59 : vector<10x1xf32>
    %c0_130 = arith.constant 0 : index
    %c0_131 = arith.constant 0 : index
    %c0_132 = arith.constant 0 : index
    %154 = vector.load %arg15[%c0_130, %c0_131, %c0_132] : memref<1x10x1xf32, #tpu.memory_space<vmem>>, vector<1x10x1xf32>
    %155 = vector.shape_cast %154 : vector<1x10x1xf32> to vector<10x1xf32>
    %156 = vector.shape_cast %153 : vector<10x1xf32> to vector<1x10x1xf32>
    tpu.vector_store %arg15[%c0_130, %c0_131, %c0_132], %156 {strides = array<i32>} : memref<1x10x1xf32, #tpu.memory_space<vmem>>, vector<1x10x1xf32>,
    %c0_133 = arith.constant 0 : index
    %c0_134 = arith.constant 0 : index
    %c0_135 = arith.constant 0 : index
    %157 = vector.load %arg16[%c0_133, %c0_134, %c0_135] : memref<1x10x1xf32, #tpu.memory_space<vmem>>, vector<1x10x1xf32>
    %158 = vector.shape_cast %157 : vector<1x10x1xf32> to vector<10x1xf32>
    %159 = vector.shape_cast %119 : vector<10x1xf32> to vector<1x10x1xf32>
    tpu.vector_store %arg16[%c0_133, %c0_134, %c0_135], %159 {strides = array<i32>} : memref<1x10x1xf32, #tpu.memory_space<vmem>>, vector<1x10x1xf32>,
    return
  }
  func.func @transform_0(%arg0: i32) -> (i32, i32, i32) {
    %c0_i32 = arith.constant 0 : i32
    %c0_i32_0 = arith.constant 0 : i32
    %c0_i32_1 = arith.constant 0 : i32
    return %arg0, %c0_i32, %c0_i32_0 : i32, i32, i32
  }
  func.func @transform_1(%arg0: i32) -> (i32, i32, i32) {
    %c0_i32 = arith.constant 0 : i32
    %c0_i32_0 = arith.constant 0 : i32
    %c0_i32_1 = arith.constant 0 : i32
    return %arg0, %c0_i32, %c0_i32_0 : i32, i32, i32
  }
  func.func @transform_2(%arg0: i32) -> (i32, i32, i32) {
    %c0_i32 = arith.constant 0 : i32
    %c0_i32_0 = arith.constant 0 : i32
    %c0_i32_1 = arith.constant 0 : i32
    %c0_i32_2 = arith.constant 0 : i32
    return %c0_i32, %c0_i32_0, %c0_i32_1 : i32, i32, i32
  }
  func.func @transform_3(%arg0: i32) -> (i32, i32, i32) {
    %c0_i32 = arith.constant 0 : i32
    %c0_i32_0 = arith.constant 0 : i32
    %c0_i32_1 = arith.constant 0 : i32
    %c0_i32_2 = arith.constant 0 : i32
    return %c0_i32, %c0_i32_0, %c0_i32_1 : i32, i32, i32
  }
  func.func @transform_4(%arg0: i32) -> (i32, i32, i32) {
    %c0_i32 = arith.constant 0 : i32
    %c0_i32_0 = arith.constant 0 : i32
    %c0_i32_1 = arith.constant 0 : i32
    %c0_i32_2 = arith.constant 0 : i32
    return %c0_i32, %c0_i32_0, %c0_i32_1 : i32, i32, i32
  }
  func.func @transform_5(%arg0: i32) -> (i32, i32, i32) {
    %c0_i32 = arith.constant 0 : i32
    %c0_i32_0 = arith.constant 0 : i32
    %c0_i32_1 = arith.constant 0 : i32
    %c0_i32_2 = arith.constant 0 : i32
    return %c0_i32, %c0_i32_0, %c0_i32_1 : i32, i32, i32
  }
  func.func @transform_6(%arg0: i32) -> (i32, i32, i32) {
    %c0_i32 = arith.constant 0 : i32
    %c0_i32_0 = arith.constant 0 : i32
    %c0_i32_1 = arith.constant 0 : i32
    %c0_i32_2 = arith.constant 0 : i32
    return %c0_i32, %c0_i32_0, %c0_i32_1 : i32, i32, i32
  }
  func.func @transform_7(%arg0: i32) -> (i32, i32, i32) {
    %c0_i32 = arith.constant 0 : i32
    %c0_i32_0 = arith.constant 0 : i32
    %c0_i32_1 = arith.constant 0 : i32
    %c0_i32_2 = arith.constant 0 : i32
    return %c0_i32, %c0_i32_0, %c0_i32_1 : i32, i32, i32
  }
  func.func @transform_8(%arg0: i32) -> (i32, i32, i32) {
    %c0_i32 = arith.constant 0 : i32
    %c0_i32_0 = arith.constant 0 : i32
    %c0_i32_1 = arith.constant 0 : i32
    %c0_i32_2 = arith.constant 0 : i32
    return %c0_i32, %c0_i32_0, %c0_i32_1 : i32, i32, i32
  }
  func.func @transform_9(%arg0: i32) -> (i32, i32, i32) {
    %c0_i32 = arith.constant 0 : i32
    %c0_i32_0 = arith.constant 0 : i32
    %c0_i32_1 = arith.constant 0 : i32
    %c0_i32_2 = arith.constant 0 : i32
    return %c0_i32, %c0_i32_0, %c0_i32_1 : i32, i32, i32
  }
  func.func @transform_10(%arg0: i32) -> (i32, i32) {
    %c0_i32 = arith.constant 0 : i32
    %c0_i32_0 = arith.constant 0 : i32
    %c0_i32_1 = arith.constant 0 : i32
    return %c0_i32, %c0_i32_0 : i32, i32
  }
  func.func @transform_11(%arg0: i32) -> (i32, i32) {
    %c0_i32 = arith.constant 0 : i32
    %c0_i32_0 = arith.constant 0 : i32
    %c0_i32_1 = arith.constant 0 : i32
    return %c0_i32, %c0_i32_0 : i32, i32
  }
  func.func @transform_12(%arg0: i32) -> (i32, i32) {
    %c0_i32 = arith.constant 0 : i32
    %c0_i32_0 = arith.constant 0 : i32
    %c0_i32_1 = arith.constant 0 : i32
    return %c0_i32, %c0_i32_0 : i32, i32
  }
  func.func @transform_13(%arg0: i32) -> (i32, i32) {
    %c0_i32 = arith.constant 0 : i32
    %c0_i32_0 = arith.constant 0 : i32
    %c0_i32_1 = arith.constant 0 : i32
    return %c0_i32, %c0_i32_0 : i32, i32
  }
  func.func @transform_14(%arg0: i32) -> (i32, i32, i32) {
    %c0_i32 = arith.constant 0 : i32
    %c0_i32_0 = arith.constant 0 : i32
    %c0_i32_1 = arith.constant 0 : i32
    return %arg0, %c0_i32, %c0_i32_0 : i32, i32, i32
  }
  func.func @transform_15(%arg0: i32) -> (i32, i32, i32) {
    %c0_i32 = arith.constant 0 : i32
    %c0_i32_0 = arith.constant 0 : i32
    %c0_i32_1 = arith.constant 0 : i32
    return %arg0, %c0_i32, %c0_i32_0 : i32, i32, i32
  }
}

</mosaic_0001>

<bundles_post_ra>
// kernel: model_forward.1
= control target key start
LH: loop header
LB: loop body
LE: loop exit
PB: predicated region body
PF: predicated region fallthrough
CT: control target
= control target key end

     0   :  { %s3087_s18 = smov 0   ;;  %s3519_s0 = inlined_call_operand.vmem [shape: f32[2,3,256], index: 0, kind: input, shape index: {}]   ;;  %s3520_s1 = inlined_call_operand.vmem [shape: f32[2,3,64], index: 1, kind: input, shape index: {}]   ;;  %s3521_s2 = inlined_call_operand.vmem [shape: f32[2,16,3], index: 2, kind: input, shape index: {}]   ;;  %s3522_s3 = inlined_call_operand.vmem [shape: f32[2,16,1], index: 3, kind: input, shape index: {}]   ;;  %s3523_s4 = inlined_call_operand.vmem [shape: f32[9,16,16], index: 4, kind: input, shape index: {}]   ;;  %s3524_s5 = inlined_call_operand.vmem [shape: f32[9,16,1], index: 5, kind: input, shape index: {}]   ;;  %s3525_s6 = inlined_call_operand.vmem [shape: f32[2,16,32], index: 6, kind: input, shape index: {}]   ;;  %s3526_s7 = inlined_call_operand.vmem [shape: f32[2,16,1], index: 7, kind: input, shape index: {}]   ;;  %s3527_s8 = inlined_call_operand.vmem [shape: f32[2,10,16], index: 8, kind: input, shape index: {}]   ;;  %s3528_s9 = inlined_call_operand.vmem [shape: f32[2,10,1], index: 9, kind: input, shape index: {}]   ;;  %s3529_s10 = inlined_call_operand.vmem [shape: f32[256,64], index: 10, kind: input, shape index: {}]   ;;  %s3530_s11 = inlined_call_operand.vmem [shape: f32[64,16], index: 11, kind: input, shape index: {}]   ;;  %s3531_s12 = inlined_call_operand.vmem [shape: f32[16,64], index: 12, kind: input, shape index: {}]   ;;  %s3532_s13 = inlined_call_operand.vmem [shape: f32[64,16], index: 13, kind: input, shape index: {}]   ;;  %s3533_s14 = inlined_call_operand.vmem [shape: f32[2,10,1], index: 14, kind: output, shape index: {0}]   ;;  %s3534_s15 = inlined_call_operand.vmem [shape: f32[2,10,1], index: 15, kind: output, shape index: {1}]  }
   0x1 LB: > { %s2583_s19 = sadd.s32 4294967295, %s3003_s18   ;;  %p2587_p0 = scmp.ge.s32.totalorder %s3003_s18, 1  ;;  %s3003_s18 = sphi %s3087_s18, %s26_s18  }
   0x2   : > { %p449_p1 = scmp.lt.s32.totalorder %s3003_s18, 3 }
   0x4   : > { %p450_p2 = pnand %p2587_p0, %p449_p1 }
   0x5   : > { %p506_p3 = scmp.lt.s32.totalorder (!%p450_p2), %s2583_s19, 1 }
   0x6   : > { %453 = sbr.rel (%p450_p2) target bundleno = 2798 (0xaee), region = 76 }
   0xb   : > { %v3005_v0 = vmov 0.0   ;;  %v530_v1 = vld [vmem:[%s3522_s3] sm:$0xff]  ;;  %s3536_s19 = smov (!%p506_p3, %s2583_s19), 1  ;;  %v3006_v2 = vmov 0   ;;  %v531_v3 = vld [vmem:[%s3522_s3 + $0x8] sm:$0xff]  ;;  %vm678_vm0 = vcmask 1042432  }
   0xc   : > { %747 = vmatprep.mubr.f32.mxu0 %v3005_v0  ;;  %2994 = vset.pattern.permute.xlu0 %v3006_v2  ;;  %s2682_s22 = sshll.u32 %s3536_s19, 3  ;;  %v525_v6 = vld [vmem:[%s3521_s2] sm:$0xff]  ;;  %vm671_vm1 = vcmask 23552   ;;  %v526_v8 = vld [vmem:[%s3521_s2 + $0x8] sm:$0xff]  ;;  %v638_v11 = vld [vmem:[%s3529_s10 + $0xf8] sm:$0xff]  ;;  %vm945_vm2 = vcmask 130048  }
   0xd   : > { %2995 = vset.pattern.permute.xlu1 %v3006_v2  ;;  %661 = vperm.xlu0 %2994, %v530_v1   ;;  %s510_s27 = scalar_lea.vmem %s3519_s0, %s2682_s22  ;;  %v561_v7 = vld [vmem:[%s3524_s5] sm:$0xff]  ;;  %v562_v9 = vld [vmem:[%s3524_s5 + $0x8] sm:$0xff]  ;;  %v622_v12 = vld [vmem:[%s3529_s10 + $0x78] sm:$0xff]  ;;  %vm1124_vm3 = vcmask 523264   ;;  %vm1568_vm4 = vcmask 261120   ;;  %vm1906_vm5 = vcmask 123904  }
   0xe   : > { %v657_v4 = vld [vmem:[%s510_s27] sm:$0x77]  ;;  %v2619_v13 = vld [vmem:[%s3524_s5 + $0x30] sm:$0xff]  ;;  %v636_v16 = vld [vmem:[%s3529_s10 + $0xe8] sm:$0xff]  ;;  %s2590_s27 = sshll.u32 %s3536_s19, 2  ;;  %s2683_s22 = sshll.u32 %s3536_s19, 4 }
   0xf   : > { %v670_v5 = vcombine.high %v657_v4, %v657_v4  ;;  %v2617_v10 = vld [vmem:[%s3524_s5 + $0x20] sm:$0xff]  ;;  %v637_v14 = vld [vmem:[%s3529_s10 + $0xf0] sm:$0xff]  ;;  %v620_v17 = vld [vmem:[%s3529_s10 + $0x68] sm:$0xff]  ;;  %s514_s30 = scalar_lea.vmem %s3520_s1, %s2590_s27  ;;  %s524_s27 = scalar_lea.vmem %s3534_s15, %s2683_s22  ;;  %vm2479_vm6 = vcmask 1024   ;;  %vm2477_vm7 = vcmask 7168  }
  0x10   : > { %v621_v15 = vld [vmem:[%s3529_s10 + $0x70] sm:$0xff]  ;;  %v593_v18 = vld [vmem:[%s3526_s7 + $0x8] sm:$0xff]  ;;  %v635_v19 = vld [vmem:[%s3529_s10 + $0xe0] sm:$0xff]  ;;  %s519_s17 = scalar_lea.vmem %s3533_s14, %s2683_s22 }
  0x11   : > { %666 = vperm.xlu0 %2994, %v531_v3   ;;  %2639 = vmatprep.subr.msk.mxu0 %vm678_vm0, %v670_v5  ;;  %v619_v20 = vld [vmem:[%s3529_s10 + $0x60] sm:$0xff]  ;;  %v634_v21 = vld [vmem:[%s3529_s10 + $0xd8] sm:$0xff]  ;;  %v2622_v23 = vld [vmem:[%s3524_s5 + $0x48] sm:$0xff] }
  0x12   : > { %2640 = vmatpush1.msk.msra.mxu0 %vm678_vm0, %v657_v4  ;;  %v618_v22 = vld [vmem:[%s3529_s10 + $0x58] sm:$0xff]  ;;  %v633_v24 = vld [vmem:[%s3529_s10 + $0xd0] sm:$0xff]  ;;  %v632_v26 = vld [vmem:[%s3529_s10 + $0xc8] sm:$0xff] }
  0x13   : > { %2641 = vmatmul.mubr.msk.f32.vlgmr.msra.gmra.mxu0 %vm671_vm1, %v525_v6  ;;  %2688 = vmatprep.subr.mxu0 %v638_v11  ;;  %v617_v25 = vld [vmem:[%s3529_s10 + $0x50] sm:$0xff]  ;;  %v616_v27 = vld [vmem:[%s3529_s10 + $0x48] sm:$0xff]  ;;  %v2624_v28 = vld [vmem:[%s3524_s5 + $0x58] sm:$0xff] }
  0x14   : > { %753 = vmatprep.mubr.f32.mxu0 %v3005_v0  ;;  %2689 = vmatpush3.msra.mxu0 %v622_v12  ;;  %v631_v29 = vld [vmem:[%s3529_s10 + $0xc0] sm:$0xff]  ;;  %v630_v31 = vld [vmem:[%s3529_s10 + $0xb8] sm:$0xff]  ;;  %v2623_v33 = vld [vmem:[%s3524_s5 + $0x50] sm:$0xff] }
  0x15   : > { %937 = vperm.xlu0 %2994, %v561_v7   ;;  %2690 = vmatprep.subr.mxu0 %v637_v14  ;;  %v615_v30 = vld [vmem:[%s3529_s10 + $0x40] sm:$0xff]  ;;  %v614_v32 = vld [vmem:[%s3529_s10 + $0x38] sm:$0xff]  ;;  %v629_v34 = vld [vmem:[%s3529_s10 + $0xb0] sm:$0xff] }
  0x16   : > { %2691 = vmatpush3.msra.mxu0 %v621_v15  ;;  %v613_v35 = vld [vmem:[%s3529_s10 + $0x30] sm:$0xff]  ;;  %v628_v36 = vld [vmem:[%s3529_s10 + $0xa8] sm:$0xff]  ;;  %v2628_v38 = vld [vmem:[%s3524_s5 + $0x78] sm:$0xff] }
  0x17   : > { %2642 = vmatmul.mubr.msk.f32.gmra.mxu0 %vm671_vm1, %v526_v8  ;;  %2692 = vmatprep.subr.mxu0 %v636_v16  ;;  %v612_v37 = vld [vmem:[%s3529_s10 + $0x28] sm:$0xff]  ;;  %v627_v39 = vld [vmem:[%s3529_s10 + $0xa0] sm:$0xff]  ;;  %v2627_v41 = vld [vmem:[%s3524_s5 + $0x70] sm:$0xff] }
  0x18   : > { %2693 = vmatpush3.msra.mxu0 %v620_v17  ;;  %v611_v40 = vld [vmem:[%s3529_s10 + $0x20] sm:$0xff]  ;;  %v2634_v42 = vld [vmem:[%s3526_s7 + $0x18] sm:$0xff]  ;;  %v625_v45 = vld [vmem:[%s3529_s10 + $0x90] sm:$0xff] }
  0x19   : > { %942 = vperm.xlu0 %2994, %v562_v9   ;;  %2694 = vmatprep.subr.mxu0 %v635_v19  ;;  %v626_v43 = vld [vmem:[%s3529_s10 + $0x98] sm:$0xff]  ;;  %v609_v46 = vld [vmem:[%s3529_s10 + $0x10] sm:$0xff]  ;;  %v624_v47 = vld [vmem:[%s3529_s10 + $0x88] sm:$0xff] }
  0x1a   : > { %2695 = vmatpush3.msra.mxu0 %v619_v20  ;;  %v610_v44 = vld [vmem:[%s3529_s10 + $0x18] sm:$0xff]  ;;  %v608_v48 = vld [vmem:[%s3529_s10 + $0x8] sm:$0xff]  ;;  %v623_v49 = vld [vmem:[%s3529_s10 + $0x80] sm:$0xff] }
  0x1b   : > { %2696 = vmatprep.subr.mxu0 %v634_v21  ;;  %v607_v50 = vld [vmem:[%s3529_s10] sm:$0xff]  ;;  %v2595_v52 = vld [vmem:[%s3521_s2 + $0x10] sm:$0xff]  ;;  %v2596_v53 = vld [vmem:[%s3521_s2 + $0x18] sm:$0xff] }
  0x1c   : > { %2697 = vmatpush3.msra.mxu0 %v618_v22  ;;  %v658_v51 = vld [vmem:[%s514_s30] sm:$0x7]  ;;  %2818 = vmatprep.mubr.msk.f32.mxu1 %vm671_vm1, %v2595_v52  ;;  %v2598_v54 = vld [vmem:[%s3522_s3 + $0x18] sm:$0xff]  ;;  %v2597_v55 = vld [vmem:[%s3522_s3 + $0x10] sm:$0xff] }
  0x1d   : > { %1208 = vperm.xlu0 %2994, %v2617_v10   ;;  %2698 = vmatprep.subr.mxu0 %v633_v24  ;;  %v2615_v56 = vld [vmem:[%s3524_s5 + $0x10] sm:$0xff]  ;;  %v2616_v57 = vld [vmem:[%s3524_s5 + $0x18] sm:$0xff]  ;;  %v2618_v58 = vld [vmem:[%s3524_s5 + $0x28] sm:$0xff] }
  0x1e   : > { %2699 = vmatpush3.msra.mxu0 %v617_v25  ;;  %2816 = vmatprep.subr.msk.mxu1 %vm678_vm0, %v658_v51  ;;  %v2620_v59 = vld [vmem:[%s3524_s5 + $0x38] sm:$0xff]  ;;  %v592_v60 = vld [vmem:[%s3526_s7] sm:$0xff]  ;;  %v2626_v62 = vld [vmem:[%s3524_s5 + $0x68] sm:$0xff] }
  0x1f   : > { %2700 = vmatprep.subr.mxu0 %v632_v26  ;;  %2817 = vmatpush3.msk.msra.mxu1 %vm678_vm0, %v658_v51  ;;  %v2621_v61 = vld [vmem:[%s3524_s5 + $0x40] sm:$0xff]  ;;  %v2630_v0 = vld [vmem:[%s3524_s5 + $0x88] sm:$0xff]  ;;  %v2633_v2 = vld [vmem:[%s3526_s7 + $0x10] sm:$0xff] }
  0x20   : > { %2701 = vmatpush3.msra.mxu0 %v616_v27  ;;  %2819 = vmatmul.mubr.msk.f32.vlgmr.msra.gmra.mxu1 %vm671_vm1, %v2596_v53  ;;  %v2625_v63 = vld [vmem:[%s3524_s5 + $0x60] sm:$0xff] }
  0x21   : > { %1301 = vperm.xlu0 %2994, %v2619_v13   ;;  %2702 = vmatprep.subr.mxu0 %v631_v29  ;;  %v2629_v1 = vld [vmem:[%s3524_s5 + $0x80] sm:$0xff] }
  0x22   : > { %2703 = vmatpush3.msra.mxu0 %v615_v30  ;;  %771 = vperm.xlu1 %2995, %v2598_v54   ;;  %v535_v17 = vld [vmem:[%s3523_s4] sm:$0xff] }
  0x23   : > { %2704 = vmatprep.subr.mxu0 %v630_v31  ;;  %2825 = vmatprep.mubr.msk.f32.mxu1 %vm945_vm2, %v535_v17  ;;  %v536_v31 = vld [vmem:[%s3523_s4 + $0x8] sm:$0xff] }
  0x24   : > { %2705 = vmatpush3.msra.mxu0 %v614_v32 }
  0x25   : > { %1565 = vperm.xlu0 %2994, %v593_v18   ;;  %2706 = vmatprep.subr.mxu0 %v629_v34  ;;  %v646_v18 = vld [vmem:[%s3530_s11 + $0x38] sm:$0xff] }
  0x26   : > { %2707 = vmatpush3.msra.mxu0 %v613_v35  ;;  %766 = vperm.xlu1 %2995, %v2597_v55   ;;  %v2600_v35 = vld [vmem:[%s3523_s4 + $0x18] sm:$0xff] }
  0x27   : > { %2708 = vmatprep.subr.mxu0 %v628_v36  ;;  %v645_v36 = vld [vmem:[%s3530_s11 + $0x30] sm:$0xff] }
  0x28   : > { %2709 = vmatpush3.msra.mxu0 %v612_v37  ;;  %v644_v37 = vld [vmem:[%s3530_s11 + $0x28] sm:$0xff] }
  0x29   : > { %1738 = vperm.xlu0 %2994, %v2622_v23   ;;  %2710 = vmatprep.subr.mxu0 %v627_v39  ;;  %v642_v39 = vld [vmem:[%s3530_s11 + $0x18] sm:$0xff] }
  0x2a   : > { %2711 = vmatpush3.msra.mxu0 %v611_v40  ;;  %1031 = vperm.xlu1 %2995, %v2615_v56   ;;  %v641_v40 = vld [vmem:[%s3530_s11 + $0x10] sm:$0xff] }
  0x2b   : > { %2712 = vmatprep.subr.mxu0 %v626_v43 }
  0x2c   : > { %2713 = vmatpush3.msra.mxu0 %v610_v44 }
  0x2d   : > { %1922 = vperm.xlu0 %2994, %v2624_v28   ;;  %2714 = vmatprep.subr.mxu0 %v625_v45 }
  0x2e   : > { %2715 = vmatpush3.msra.mxu0 %v609_v46  ;;  %1036 = vperm.xlu1 %2995, %v2616_v57  }
  0x2f   : > { %2716 = vmatprep.subr.mxu0 %v624_v47 }
  0x30   : > { %2717 = vmatpush3.msra.mxu0 %v608_v48 }
  0x31   : > { %1917 = vperm.xlu0 %2994, %v2623_v33   ;;  %2718 = vmatprep.subr.mxu0 %v623_v49  ;;  %v2599_v33 = vld [vmem:[%s3523_s4 + $0x10] sm:$0xff] }
  0x32   : > { %2719 = vmatpush3.msra.mxu0 %v607_v50  ;;  %1213 = vperm.xlu1 %2995, %v2618_v58  }
  0x33   : > { %2875 = vmatprep.subr.mxu0 %v646_v18 }
  0x35   : > { %2110 = vperm.xlu0 %2994, %v2628_v38   ;;  %v643_v38 = vld [vmem:[%s3530_s11 + $0x20] sm:$0xff] }
  0x36   : > { %1306 = vperm.xlu1 %2995, %v2620_v59  }
  0x39   : > { %2105 = vperm.xlu0 %2994, %v2627_v41   ;;  %v640_v41 = vld [vmem:[%s3530_s11 + $0x8] sm:$0xff] }
  0x3a   : > { %1560 = vperm.xlu1 %2995, %v592_v60  }
  0x3d   : > { %2302 = vperm.xlu0 %2994, %v2634_v42   ;;  %v639_v42 = vld [vmem:[%s3530_s11] sm:$0xff] }
  0x3e   : > { %1733 = vperm.xlu1 %2995, %v2621_v61   ;;  %v2601_v61 = vld [vmem:[%s3523_s4 + $0x20] sm:$0xff] }
  0x42   : > { %2015 = vperm.xlu1 %2995, %v2626_v62  }
  0x46   : > { %2010 = vperm.xlu1 %2995, %v2625_v63  }
  0x4a   : > { %2203 = vperm.xlu1 %2995, %v2630_v0   ;;  %v2602_v0 = vld [vmem:[%s3523_s4 + $0x28] sm:$0xff] }
  0x4e   : > { %2198 = vperm.xlu1 %2995, %v2629_v1   ;;  %v2603_v1 = vld [vmem:[%s3523_s4 + $0x30] sm:$0xff] }
  0x52   : > { %2297 = vperm.xlu1 %2995, %v2633_v2   ;;  %v2604_v2 = vld [vmem:[%s3523_s4 + $0x38] sm:$0xff] }
  0x88   : > { %v662_v3 = vpop.permute.xlu0 %661 }
  0x8c   : > { %v667_v9 = vpop.permute.xlu0 %666 }
  0x90   : > { %v938_v44 = vpop.permute.xlu0 %937 }
  0x94   : > { %v943_v49 = vpop.permute.xlu0 %942 }
  0x9d   : > { %v772_v20 = vpop.permute.xlu1 %771 }
  0xa1   : > { %v767_v28 = vpop.permute.xlu1 %766 }
  0xa5   : > { %v1032_v43 = vpop.permute.xlu1 %1031 }
  0xa9   : > { %v1037_v47 = vpop.permute.xlu1 %1036 }
  0xd3   : > { %v749_v4 = vpop.f32.mrf.mxu0 }
  0xd4   : > { %v750_v5 = vadd.f32 %v749_v4, %v662_v3  ;;  %v647_v4 = vld [vmem:[%s3531_s12] sm:$0xff] }
  0xd5   : > { %v751_v6 = vpop.f32.mrf.mxu0 }
  0xd6   : > { %v752_v7 = vadd.f32 %v751_v6, %v662_v3  ;;  %v760_v11 = vmax.f32 %v750_v5, 0.0  ;;  %v648_v3 = vld [vmem:[%s3531_s12 + $0x8] sm:$0xff]  ;;  %v1214_v6 = vpop.permute.xlu1 %1213 }
  0xd7   : > { %v755_v8 = vpop.f32.mrf.mxu0 }
  0xd8   : > { %v761_v10 = vmax.f32 %v752_v7, 0.0  ;;  %v756_v12 = vadd.f32 %v755_v8, %v667_v9  ;;  %v1209_v7 = vpop.permute.xlu0 %1208 }
  0xd9   : > { %v757_v13 = vpop.f32.mrf.mxu0 }
  0xda   : > { %v758_v14 = vadd.f32 %v757_v13, %v667_v9  ;;  %924 = vmatprep.mubr.f32.mxu0 %v761_v10  ;;  %v762_v16 = vmax.f32 %v756_v12, 0.0 }
  0xdb   : > { %925 = vmatmul.mubr.f32.vlgmr.msra.gmra.mxu0 %v760_v11 }
  0xdc   : > { %v763_v15 = vmax.f32 %v758_v14, 0.0  ;;  %2876 = vmatpush3.msra.mxu0 %v646_v18 }
  0xdd   : > { %2877 = vmatprep.subr.mxu0 %v645_v36 }
  0xde   : > { %929 = vmatprep.mubr.f32.mxu0 %v763_v15  ;;  %2878 = vmatpush3.msra.mxu0 %v645_v36  ;;  %v1302_v15 = vpop.permute.xlu0 %1301 }
  0xdf   : > { %930 = vmatmul.mubr.f32.gmra.mxu0 %v762_v16  ;;  %2879 = vmatprep.subr.mxu0 %v644_v37  ;;  %v1307_v16 = vpop.permute.xlu1 %1306 }
  0xe0   : > { %v2820_v22 = vpop.f32.mrf.mxu1  ;;  %2880 = vmatpush3.msra.mxu0 %v644_v37 }
  0xe1   : > { %v855_v26 = vadd.f32 %v2820_v22, %v772_v20  ;;  %2881 = vmatprep.subr.mxu0 %v643_v38 }
  0xe2   : > { %v849_v24 = vpop.f32.mrf.mxu1  ;;  %2882 = vmatpush3.msra.mxu0 %v643_v38 }
  0xe3   : > { %v850_v30 = vadd.f32 %v849_v24, %v767_v28  ;;  %v3309_v32 = vmax.f32 %v855_v26, 0.0  ;;  %2883 = vmatprep.subr.mxu0 %v642_v39 }
  0xe4   : > { %2884 = vmatpush3.msra.mxu0 %v642_v39 }
  0xe5   : > { %v3314_v34 = vmax.f32 %v850_v30, 0.0  ;;  %2885 = vmatprep.subr.mxu0 %v641_v40 }
  0xe6   : > { %2886 = vmatpush3.msra.mxu0 %v641_v40 }
  0xe7   : > { %2887 = vmatprep.subr.mxu0 %v640_v41 }
  0xe8   : > { %2888 = vmatpush3.msra.mxu0 %v640_v41 }
  0xe9   : > { %2889 = vmatprep.subr.mxu0 %v639_v42 }
  0xea   : > { %2890 = vmatpush3.msra.mxu0 %v639_v42 }
 0x19b   : > { %v2720_v19 = vpop.f32.mrf.mxu0 }
 0x19d   : > { %v2721_v21 = vpop.f32.mrf.mxu0 }
 0x19e   : > { %v2722_v29 = vadd.f32 %v2721_v21, %v2720_v19 }
 0x19f   : > { %v2723_v23 = vpop.f32.mrf.mxu0 }
 0x1a1   : > { %v2724_v25 = vpop.f32.mrf.mxu0 }
 0x1a2   : > { %v2725_v27 = vadd.f32 %v2724_v25, %v2723_v23  ;;  %v587_v25 = vld [vmem:[%s3525_s6] sm:$0xff] }
 0x1a4   : > { %2821 = vmatprep.subr.mxu1 %v2725_v27 }
 0x1a5   : > { %2822 = vmatpush3.msra.mxu1 %v2725_v27 }
 0x1a6   : > { %2823 = vmatprep.subr.mxu1 %v2722_v29 }
 0x1a7   : > { %2824 = vmatpush3.msra.mxu1 %v2722_v29 }
 0x1a8   : > { %2826 = vmatmul.mubr.msk.f32.vlgmr.msra.gmra.mxu1 %vm945_vm2, %v536_v31  ;;  %2828 = vmatprep.subr.mxu1 %v3309_v32 }
 0x1a9   : > { %2829 = vmatpush3.msra.mxu1 %v3309_v32  ;;  %2832 = vmatprep.mubr.msk.f32.mxu1 %vm945_vm2, %v2599_v33  ;;  %v588_v33 = vld [vmem:[%s3525_s6 + $0x8] sm:$0xff] }
 0x1aa   : > { %2830 = vmatprep.subr.mxu1 %v3314_v34 }
 0x1ab   : > { %2831 = vmatpush3.msra.mxu1 %v3314_v34 }
 0x1ac   : > { %2833 = vmatmul.mubr.msk.f32.vlgmr.msra.gmra.mxu1 %vm945_vm2, %v2600_v35  ;;  %2835 = vmatprep.subr.mxu1 %v646_v18  ;;  %v656_v35 = vld [vmem:[%s3532_s13 + $0x38] sm:$0xff] }
 0x1ad   : > { %2836 = vmatpush3.msra.mxu1 %v646_v18 }
 0x1ae   : > { %2837 = vmatprep.subr.mxu1 %v645_v36 }
 0x1af   : > { %2838 = vmatpush3.msra.mxu1 %v645_v36  ;;  %v655_v36 = vld [vmem:[%s3532_s13 + $0x30] sm:$0xff] }
 0x1b0   : > { %2839 = vmatprep.subr.mxu1 %v644_v37 }
 0x1b1   : > { %2840 = vmatpush3.msra.mxu1 %v644_v37  ;;  %v654_v37 = vld [vmem:[%s3532_s13 + $0x28] sm:$0xff] }
 0x1b2   : > { %2841 = vmatprep.subr.mxu1 %v643_v38 }
 0x1b3   : > { %2842 = vmatpush3.msra.mxu1 %v643_v38  ;;  %v653_v38 = vld [vmem:[%s3532_s13 + $0x20] sm:$0xff] }
 0x1b4   : > { %2843 = vmatprep.subr.mxu1 %v642_v39 }
 0x1b5   : > { %2844 = vmatpush3.msra.mxu1 %v642_v39  ;;  %v652_v39 = vld [vmem:[%s3532_s13 + $0x18] sm:$0xff] }
 0x1b6   : > { %2845 = vmatprep.subr.mxu1 %v641_v40 }
 0x1b7   : > { %2846 = vmatpush3.msra.mxu1 %v641_v40  ;;  %v650_v40 = vld [vmem:[%s3532_s13 + $0x8] sm:$0xff] }
 0x1b8   : > { %2847 = vmatprep.subr.mxu1 %v640_v41 }
 0x1b9   : > { %2848 = vmatpush3.msra.mxu1 %v640_v41  ;;  %v649_v41 = vld [vmem:[%s3532_s13] sm:$0xff] }
 0x1ba   : > { %2849 = vmatprep.subr.mxu1 %v639_v42 }
 0x1bb   : > { %2850 = vmatpush3.msra.mxu1 %v639_v42  ;;  %v2605_v42 = vld [vmem:[%s3523_s4 + $0x40] sm:$0xff] }
 0x268   : > { %v2827_v45 = vpop.f32.mrf.mxu1 }
 0x269   : > { %v1024_v52 = vadd.f32 %v2827_v45, %v943_v49 }
 0x26a   : > { %v1018_v46 = vpop.f32.mrf.mxu1 }
 0x26b   : > { %v1019_v50 = vadd.f32 %v1018_v46, %v938_v44  ;;  %v1028_v58 = vmax.f32 %v1024_v52, 0.0  ;;  %v1566_v46 = vpop.permute.xlu0 %1565  ;;  %v598_v52 = vld [vmem:[%s3527_s8 + $0x8] sm:$0x3] }
 0x26c   : > { %v2834_v48 = vpop.f32.mrf.mxu1 }
 0x26d   : > { %v1117_v51 = vadd.f32 %v2834_v48, %v1037_v47  ;;  %v1027_v56 = vmax.f32 %v1019_v50, 0.0  ;;  %v2606_v48 = vld [vmem:[%s3523_s4 + $0x48] sm:$0xff] }
 0x26e   : > { %v1111_v53 = vpop.f32.mrf.mxu1 }
 0x26f   : > { %v1112_v54 = vadd.f32 %v1111_v53, %v1032_v43  ;;  %v1121_v55 = vmax.f32 %v1117_v51, 0.0  ;;  %v597_v51 = vld [vmem:[%s3527_s8] sm:$0xff]  ;;  %v2607_v53 = vld [vmem:[%s3523_s4 + $0x50] sm:$0xff] }
 0x271   : > { %v1120_v57 = vmax.f32 %v1112_v54, 0.0  ;;  %v1123_v60 = vadd.f32 %v1121_v55, %v1028_v58  ;;  %v1739_v54 = vpop.permute.xlu0 %1738 }
 0x273   : > { %v1122_v59 = vadd.f32 %v1120_v57, %v1027_v56 }
 0x275   : > { %2851 = vmatprep.mubr.msk.f32.mxu1 %vm1124_vm3, %v1122_v59 }
 0x276   : > { %2852 = vmatmul.mubr.msk.f32.vlgmr.msra.gmra.mxu1 %vm1124_vm3, %v1123_v60  ;;  %v2608_v60 = vld [vmem:[%s3523_s4 + $0x58] sm:$0xff] }
 0x277   : > { %2858 = vmatprep.mubr.msk.f32.mxu1 %vm945_vm2, %v2601_v61  ;;  %v2609_v61 = vld [vmem:[%s3523_s4 + $0x60] sm:$0xff] }
 0x336   : > { %v2853_v62 = vpop.f32.mrf.mxu1 }
 0x337   : > { %2854 = vmatprep.subr.mxu1 %v2853_v62  ;;  %v1555_v30 = vmax.f32 %v2853_v62, 0.0 }
 0x338   : > { %v1197_v63 = vpop.f32.mrf.mxu1  ;;  %2855 = vmatpush3.msra.mxu1 %v2853_v62  ;;  %v2610_v62 = vld [vmem:[%s3523_s4 + $0x68] sm:$0xff] }
 0x339   : > { %2856 = vmatprep.subr.mxu1 %v1197_v63  ;;  %v1554_v31 = vmax.f32 %v1197_v63, 0.0 }
 0x33a   : > { %2857 = vmatpush3.msra.mxu1 %v1197_v63  ;;  %v2613_v63 = vld [vmem:[%s3523_s4 + $0x80] sm:$0xff] }
 0x33b   : > { %2859 = vmatmul.mubr.msk.f32.vlgmr.msra.gmra.mxu1 %vm945_vm2, %v2602_v0  ;;  %2861 = vmatprep.subr.mxu1 %v3309_v32  ;;  %v2614_v0 = vld [vmem:[%s3523_s4 + $0x88] sm:$0xff] }
 0x33c   : > { %2862 = vmatpush3.msra.mxu1 %v3309_v32  ;;  %2865 = vmatprep.mubr.msk.f32.mxu1 %vm945_vm2, %v2603_v1 }
 0x33d   : > { %2863 = vmatprep.subr.mxu1 %v3314_v34 }
 0x33e   : > { %2864 = vmatpush3.msra.mxu1 %v3314_v34 }
 0x33f   : > { %2866 = vmatmul.mubr.msk.f32.vlgmr.msra.gmra.mxu1 %vm945_vm2, %v2604_v2  ;;  %2868 = vmatprep.subr.mxu1 %v648_v3 }
 0x340   : > { %2869 = vmatpush3.msra.mxu1 %v648_v3 }
 0x341   : > { %2870 = vmatprep.subr.mxu1 %v647_v4 }
 0x342   : > { %2871 = vmatpush3.msra.mxu1 %v647_v4 }
 0x3fb   : > { %v2860_v5 = vpop.f32.mrf.mxu1 }
 0x3fc   : > { %v1294_v8 = vadd.f32 %v2860_v5, %v1214_v6  ;;  %v2611_v5 = vld [vmem:[%s3523_s4 + $0x70] sm:$0xff] }
 0x3fd   : > { %v1288_v9 = vpop.f32.mrf.mxu1 }
 0x3fe   : > { %v1289_v10 = vadd.f32 %v1288_v9, %v1209_v7  ;;  %v1298_v12 = vmax.f32 %v1294_v8, 0.0  ;;  %v1923_v7 = vpop.permute.xlu0 %1922 }
 0x3ff   : > { %v2867_v13 = vpop.f32.mrf.mxu1 }
 0x400   : > { %v1297_v11 = vmax.f32 %v1289_v10, 0.0  ;;  %v1387_v18 = vadd.f32 %v2867_v13, %v1307_v16 }
 0x401   : > { %v1381_v14 = vpop.f32.mrf.mxu1 }
 0x402   : > { %2872 = vmatprep.mubr.msk.f32.mxu1 %vm945_vm2, %v1297_v11  ;;  %v1382_v17 = vadd.f32 %v1381_v14, %v1302_v15  ;;  %v1391_v21 = vmax.f32 %v1387_v18, 0.0  ;;  %v1918_v9 = vpop.permute.xlu0 %1917 }
 0x403   : > { %2873 = vmatmul.mubr.msk.f32.vlgmr.msra.gmra.mxu1 %vm945_vm2, %v1298_v12 }
 0x404   : > { %v1390_v20 = vmax.f32 %v1382_v17, 0.0  ;;  %2902 = vmatprep.mubr.msk.f32.mxu1 %vm1568_vm4, %v587_v25 }
 0x406   : > { %v2111_v11 = vpop.permute.xlu0 %2110 }
 0x40a   : > { %v2106_v13 = vpop.permute.xlu0 %2105 }
 0x40e   : > { %v3463_v17 = vpop.permute.xlu0 %2302 }
 0x4c3   : > { %v2874_v19 = vpop.f32.mrf.mxu1 }
 0x4c4   : > { %v1470_v24 = vadd.f32 %v2874_v19, %v1391_v21 }
 0x4c5   : > { %v1464_v22 = vpop.f32.mrf.mxu1 }
 0x4c6   : > { %v1465_v23 = vadd.f32 %v1464_v22, %v1390_v20  ;;  %v603_v22 = vld [vmem:[%s3528_s9 + $0x8] sm:$0x3] }
 0x4c8   : > { %2891 = vmatprep.mubr.msk.f32.mxu0 %vm1124_vm3, %v1465_v23 }
 0x4c9   : > { %2892 = vmatmul.mubr.msk.f32.vlgmr.msra.gmra.mxu0 %vm1124_vm3, %v1470_v24 }
 0x4ca   : > { %2928 = vmatprep.mubr.msk.f32.mxu0 %vm945_vm2, %v2605_v42 }
 0x589   : > { %v2893_v26 = vpop.f32.mrf.mxu0 }
 0x58a   : > { %v1557_v27 = vmax.f32 %v2893_v26, 0.0 }
 0x58b   : > { %v1545_v28 = vpop.f32.mrf.mxu0 }
 0x58c   : > { %v1556_v29 = vmax.f32 %v1545_v28, 0.0  ;;  %2894 = vmatprep.subr.mxu1 %v1557_v27 }
 0x58d   : > { %2895 = vmatpush3.msra.mxu1 %v1557_v27 }
 0x58e   : > { %2896 = vmatprep.subr.mxu1 %v1556_v29 }
 0x58f   : > { %2897 = vmatpush3.msra.mxu1 %v1556_v29  ;;  %v602_v29 = vld [vmem:[%s3528_s9] sm:$0xff] }
 0x590   : > { %2898 = vmatprep.subr.mxu1 %v1555_v30 }
 0x591   : > { %2899 = vmatpush3.msra.mxu1 %v1555_v30 }
 0x592   : > { %2900 = vmatprep.subr.mxu1 %v1554_v31 }
 0x593   : > { %2901 = vmatpush3.msra.mxu1 %v1554_v31 }
 0x594   : > { %2903 = vmatmul.mubr.msk.f32.vlgmr.msra.gmra.mxu1 %vm1568_vm4, %v588_v33  ;;  %2905 = vmatprep.subr.mxu1 %v656_v35 }
 0x595   : > { %2906 = vmatpush3.msra.mxu1 %v656_v35  ;;  %2921 = vmatprep.mubr.msk.f32.mxu1 %vm1124_vm3, %v3314_v34  ;;  %v651_v34 = vld [vmem:[%s3532_s13 + $0x10] sm:$0xff] }
 0x596   : > { %2907 = vmatprep.subr.mxu1 %v655_v36 }
 0x597   : > { %2908 = vmatpush3.msra.mxu1 %v655_v36 }
 0x598   : > { %2909 = vmatprep.subr.mxu1 %v654_v37 }
 0x599   : > { %2910 = vmatpush3.msra.mxu1 %v654_v37 }
 0x59a   : > { %2911 = vmatprep.subr.mxu1 %v653_v38 }
 0x59b   : > { %2912 = vmatpush3.msra.mxu1 %v653_v38 }
 0x59c   : > { %2913 = vmatprep.subr.mxu1 %v652_v39 }
 0x59d   : > { %2914 = vmatpush3.msra.mxu1 %v652_v39 }
 0x59e   : > { %2915 = vmatprep.subr.mxu1 %v651_v34 }
 0x59f   : > { %2916 = vmatpush3.msra.mxu1 %v651_v34  ;;  %v2612_v34 = vld [vmem:[%s3523_s4 + $0x78] sm:$0xff] }
 0x5a0   : > { %2917 = vmatprep.subr.mxu1 %v650_v40 }
 0x5a1   : > { %2918 = vmatpush3.msra.mxu1 %v650_v40  ;;  %v2631_v40 = vld [vmem:[%s3525_s6 + $0x10] sm:$0xff] }
 0x5a2   : > { %2919 = vmatprep.subr.mxu1 %v649_v41 }
 0x5a3   : > { %2920 = vmatpush3.msra.mxu1 %v649_v41 }
 0x5a4   : > { %2922 = vmatmul.mubr.msk.f32.vlgmr.msra.gmra.mxu1 %vm1124_vm3, %v3309_v32  ;;  %v1561_v32 = vpop.permute.xlu1 %1560 }
 0x5a5   : > { %2956 = vmatprep.mubr.msk.f32.mxu1 %vm945_vm2, %v2611_v5  ;;  %v2637_v5 = vld [vmem:[%s3528_s9 + $0x10] sm:$0xff] }
 0x5a8   : > { %v1734_v57 = vpop.permute.xlu1 %1733 }
 0x5ac   : > { %v2016_v6 = vpop.permute.xlu1 %2015 }
 0x5b0   : > { %v2011_v8 = vpop.permute.xlu1 %2010 }
 0x5b4   : > { %v2204_v10 = vpop.permute.xlu1 %2203 }
 0x5b8   : > { %v2199_v12 = vpop.permute.xlu1 %2198 }
 0x5bc   : > { %v3461_v15 = vpop.permute.xlu1 %2297 }
 0x654   : > { %v2904_v43 = vpop.f32.mrf.mxu1 }
 0x655   : > { %v1647_v49 = vadd.f32 %v2904_v43, %v1566_v46 }
 0x656   : > { %v1641_v44 = vpop.f32.mrf.mxu1 }
 0x657   : > { %v1642_v50 = vadd.f32 %v1641_v44, %v1561_v32 }
 0x664   : > { %v2923_v45 = vpop.f32.mrf.mxu1 }
 0x665   : > { %2924 = vmatprep.subr.mxu0 %v2923_v45 }
 0x666   : > { %v1722_v47 = vpop.f32.mrf.mxu1  ;;  %2925 = vmatpush3.msra.mxu0 %v2923_v45 }
 0x667   : > { %2926 = vmatprep.subr.mxu0 %v1722_v47 }
 0x668   : > { %2927 = vmatpush3.msra.mxu0 %v1722_v47 }
 0x669   : > { %2929 = vmatmul.mubr.msk.f32.vlgmr.msra.gmra.mxu0 %vm945_vm2, %v2606_v48  ;;  %2931 = vmatprep.subr.mxu0 %v1647_v49 }
 0x66a   : > { %2932 = vmatpush3.msra.mxu0 %v1647_v49  ;;  %2935 = vmatprep.mubr.msk.f32.mxu0 %vm945_vm2, %v597_v51 }
 0x66b   : > { %2933 = vmatprep.subr.mxu0 %v1642_v50 }
 0x66c   : > { %2934 = vmatpush3.msra.mxu0 %v1642_v50 }
 0x66d   : > { %2936 = vmatmul.mubr.msk.f32.vlgmr.msra.gmra.mxu0 %vm945_vm2, %v598_v52 }
 0x66e   : > { %2942 = vmatprep.mubr.msk.f32.mxu0 %vm945_vm2, %v2607_v53 }
 0x729   : > { %v2930_v55 = vpop.f32.mrf.mxu0 }
 0x72a   : > { %v1819_v56 = vadd.f32 %v2930_v55, %v1739_v54 }
 0x72b   : > { %v1813_v58 = vpop.f32.mrf.mxu0 }
 0x72c   : > { %v1814_v59 = vadd.f32 %v1813_v58, %v1734_v57  ;;  %2938 = vmatprep.subr.mxu0 %v1819_v56  ;;  %v2632_v58 = vld [vmem:[%s3525_s6 + $0x18] sm:$0xff] }
 0x72d   : > { %2939 = vmatpush3.msra.mxu0 %v1819_v56  ;;  %v2937_v1 = vpop.f32.mrf.mxu0 }
 0x72e   : > { %2940 = vmatprep.subr.mxu0 %v1814_v59  ;;  %v1907_v2 = vsel %vm1906_vm5, %v2937_v1, 0.0 }
 0x72f   : > { %2941 = vmatpush3.msra.mxu0 %v1814_v59  ;;  %v1894_v3 = vpop.f32.mrf.mxu0  ;;  %1908 = vadd.xlane.f32.xlu1 %v1907_v2 }
 0x730   : > { %2943 = vmatmul.mubr.msk.f32.vlgmr.msra.gmra.mxu0 %vm945_vm2, %v2608_v60  ;;  %2945 = vmatprep.subr.mxu0 %v1647_v49  ;;  %v1903_v4 = vsel %vm945_vm2, %v1894_v3, 0.0 }
 0x731   : > { %2946 = vmatpush3.msra.mxu0 %v1647_v49  ;;  %2949 = vmatprep.mubr.msk.f32.mxu0 %vm945_vm2, %v2609_v61 }
 0x732   : > { %2947 = vmatprep.subr.mxu0 %v1642_v50  ;;  %1904 = vadd.xlane.f32.xlu0 %v1903_v4 }
 0x733   : > { %2948 = vmatpush3.msra.mxu0 %v1642_v50 }
 0x734   : > { %2950 = vmatmul.mubr.msk.f32.vlgmr.msra.gmra.mxu0 %vm945_vm2, %v2610_v62  ;;  %2959 = vmatprep.subr.mxu0 %v1819_v56 }
 0x735   : > { %2960 = vmatpush3.msra.mxu0 %v1819_v56  ;;  %2963 = vmatprep.mubr.msk.f32.mxu0 %vm945_vm2, %v2613_v63 }
 0x736   : > { %2961 = vmatprep.subr.mxu0 %v1814_v59 }
 0x737   : > { %2962 = vmatpush3.msra.mxu0 %v1814_v59  ;;  %v2635_v59 = vld [vmem:[%s3527_s8 + $0x10] sm:$0xff] }
 0x738   : > { %2964 = vmatmul.mubr.msk.f32.vlgmr.msra.gmra.mxu0 %vm945_vm2, %v2614_v0  ;;  %v2636_v0 = vld [vmem:[%s3527_s8 + $0x18] sm:$0x3] }
 0x739   : > { %2981 = vmatprep.mubr.msk.f32.mxu0 %vm945_vm2, %v2635_v59 }
 0x7b8   : > { %v1909_v23 = vpop.xlane.xlu1 %1908 }
 0x7b9   : > { %v1912_v25 = vmul.f32 0.0625, %v1909_v23 }
 0x7bb   : > { %v1905_v30 = vpop.xlane.xlu0 %1904  ;;  %v1914_v31 = vadd.f32 %v1912_v25, %v603_v22 }
 0x7bc   : > { %v1911_v33 = vmul.f32 0.0625, %v1905_v30 }
 0x7bd   : > { %2482 = vst.msk [vmem:[%s524_s27 + $0x8] sm:$0x3] %vm2479_vm6, %v1914_v31 }
 0x7be   : > { %v1913_v38 = vadd.f32 %v1911_v33, %v602_v29 }
 0x7c0   : > { %2481 = vst.msk [vmem:[%s524_s27] sm:$0xff] %vm2477_vm7, %v1913_v38 }
 0x7f0   : > { %v2944_v14 = vpop.f32.mrf.mxu0 }
 0x7f1   : > { %v2003_v18 = vadd.f32 %v2944_v14, %v1923_v7 }
 0x7f2   : > { %v1997_v16 = vpop.f32.mrf.mxu0 }
 0x7f3   : > { %v1998_v20 = vadd.f32 %v1997_v16, %v1918_v9  ;;  %v2007_v26 = vmax.f32 %v2003_v18, 0.0  ;;  %v2638_v9 = vld [vmem:[%s3528_s9 + $0x18] sm:$0x3] }
 0x7f4   : > { %v2951_v19 = vpop.f32.mrf.mxu0 }
 0x7f5   : > { %v2096_v21 = vadd.f32 %v2951_v19, %v2016_v6  ;;  %v2006_v35 = vmax.f32 %v1998_v20, 0.0 }
 0x7f6   : > { %v2090_v24 = vpop.f32.mrf.mxu0 }
 0x7f7   : > { %v2100_v27 = vmax.f32 %v2096_v21, 0.0  ;;  %v2091_v28 = vadd.f32 %v2090_v24, %v2011_v8 }
 0x7f8   : > { %v2965_v41 = vpop.f32.mrf.mxu0 }
 0x7f9   : > { %v2102_v36 = vadd.f32 %v2100_v27, %v2007_v26  ;;  %v2099_v37 = vmax.f32 %v2091_v28, 0.0  ;;  %v2284_v43 = vadd.f32 %v2965_v41, %v2204_v10 }
 0x7fa   : > { %v2278_v42 = vpop.f32.mrf.mxu0 }
 0x7fb   : > { %v2101_v39 = vadd.f32 %v2099_v37, %v2006_v35  ;;  %2952 = vmatprep.subr.mxu1 %v2102_v36  ;;  %v2279_v45 = vadd.f32 %v2278_v42, %v2199_v12  ;;  %v2288_v48 = vmax.f32 %v2284_v43, 0.0  ;;  %v2292_v56 = vmax.f32 %v2102_v36, 0.0 }
 0x7fc   : > { %2953 = vmatpush3.msra.mxu1 %v2102_v36 }
 0x7fd   : > { %2954 = vmatprep.subr.mxu1 %v2101_v39  ;;  %v2287_v50 = vmax.f32 %v2279_v45, 0.0  ;;  %v2291_v57 = vmax.f32 %v2101_v39, 0.0 }
 0x7fe   : > { %2955 = vmatpush3.msra.mxu1 %v2101_v39 }
 0x7ff   : > { %2957 = vmatmul.mubr.msk.f32.vlgmr.msra.gmra.mxu1 %vm945_vm2, %v2612_v34 }
 0x800   : > { %2974 = vmatprep.mubr.msk.f32.mxu1 %vm1568_vm4, %v2631_v40 }
 0x8bf   : > { %v2958_v44 = vpop.f32.mrf.mxu1 }
 0x8c0   : > { %v2191_v46 = vadd.f32 %v2958_v44, %v2111_v11 }
 0x8c1   : > { %v2185_v47 = vpop.f32.mrf.mxu1 }
 0x8c2   : > { %v2195_v49 = vmax.f32 %v2191_v46, 0.0  ;;  %v2186_v32 = vadd.f32 %v2185_v47, %v2106_v13 }
 0x8c4   : > { %v2290_v51 = vadd.f32 %v2288_v48, %v2195_v49  ;;  %v2194_v52 = vmax.f32 %v2186_v32, 0.0 }
 0x8c6   : > { %v2294_v53 = vmax.f32 %v2290_v51, 0.0  ;;  %v2289_v54 = vadd.f32 %v2287_v50, %v2194_v52 }
 0x8c8   : > { %v2293_v55 = vmax.f32 %v2289_v54, 0.0  ;;  %2966 = vmatprep.subr.mxu1 %v2294_v53 }
 0x8c9   : > { %2967 = vmatpush3.msra.mxu1 %v2294_v53 }
 0x8ca   : > { %2968 = vmatprep.subr.mxu1 %v2293_v55 }
 0x8cb   : > { %2969 = vmatpush3.msra.mxu1 %v2293_v55 }
 0x8cc   : > { %2970 = vmatprep.subr.mxu1 %v2292_v56 }
 0x8cd   : > { %2971 = vmatpush3.msra.mxu1 %v2292_v56 }
 0x8ce   : > { %2972 = vmatprep.subr.mxu1 %v2291_v57 }
 0x8cf   : > { %2973 = vmatpush3.msra.mxu1 %v2291_v57 }
 0x8d0   : > { %2975 = vmatmul.mubr.msk.f32.vlgmr.msra.gmra.mxu1 %vm1568_vm4, %v2632_v58 }
 0x990   : > { %v2976_v60 = vpop.f32.mrf.mxu1 }
 0x991   : > { %v2383_v61 = vadd.f32 %v2976_v60, %v3463_v17 }
 0x992   : > { %v2377_v62 = vpop.f32.mrf.mxu1 }
 0x993   : > { %v2378_v63 = vadd.f32 %v2377_v62, %v3461_v15  ;;  %2977 = vmatprep.subr.mxu0 %v2383_v61 }
 0x994   : > { %2978 = vmatpush3.msra.mxu0 %v2383_v61 }
 0x995   : > { %2979 = vmatprep.subr.mxu0 %v2378_v63 }
 0x996   : > { %2980 = vmatpush3.msra.mxu0 %v2378_v63 }
 0x997   : > { %2982 = vmatmul.mubr.msk.f32.vlgmr.msra.gmra.mxu0 %vm945_vm2, %v2636_v0 }
 0xa57   : > { %v2983_v1 = vpop.f32.mrf.mxu0 }
 0xa58   : > { %v2470_v4 = vsel %vm1906_vm5, %v2983_v1, 0.0 }
 0xa59   : > { %v2458_v2 = vpop.f32.mrf.mxu0 }
 0xa5a   : > { %v2467_v3 = vsel %vm945_vm2, %v2458_v2, 0.0 }
 0xa5b   : > { %2468 = vadd.xlane.f32.xlu0 %v2467_v3 }
 0xa5f   : > { %2471 = vadd.xlane.f32.xlu0 %v2470_v4 }
 0xae4   : > { %v2469_v6 = vpop.xlane.xlu0 %2468 }
 0xae5   : > { %v2473_v7 = vmul.f32 0.0625, %v2469_v6 }
 0xae7   : > { %v2475_v8 = vadd.f32 %v2637_v5, %v2473_v7 }
 0xae8   : > { %v2472_v10 = vpop.xlane.xlu0 %2471 }
 0xae9   : > { %2478 = vst.msk [vmem:[%s519_s17] sm:$0xff] %vm2477_vm7, %v2475_v8  ;;  %v2474_v11 = vmul.f32 0.0625, %v2472_v10 }
 0xaeb   : > { %v2476_v12 = vadd.f32 %v2638_v9, %v2474_v11 }
 0xaed   : > { %2480 = vst.msk [vmem:[%s519_s17 + $0x8] sm:$0x3] %vm2479_vm6, %v2476_v12 }
 0xaee PF: > { %s26_s18 = sadd.s32 1, %s3003_s18  }
 0xaef   : > { %p23_p4 = scmp.ge.s32.totalorder %s26_s18, 4  }
 0xaf1   :  { %25 = sbr.rel (!%p23_p4) target bundleno = 1 (0x1), region = 143 }

</bundles_post_ra>
